<compile_context>
chip_gen: v6e
topology: v6e:2x2x1
jax: 0.10.0
libtpu: 0.0.40
codegen_flags: <defaults>
</compile_context>

<pallas_src>
import jax
import jax.numpy as jnp
from jax.experimental import pallas as pl
from jax.experimental.pallas import tpu as pltpu

_EPS = 1e-5


def _round_up(x, m):
    return ((x + m - 1) // m) * m


# ----------------------------------------------------------------------------
# BatchNorm folding (eval mode, running statistics).
# The original forward uses bn1 after conv1 AND after conv2; bn2 is unused.
# ----------------------------------------------------------------------------
def _fold_params(params, eps=_EPS):
    s1 = params["bn1_gamma"] * jax.lax.rsqrt(params["bn1_var"] + eps)
    w1f = params["conv1_w"] * s1[:, None, None, None]
    b1f = (params["conv1_b"] - params["bn1_mean"]) * s1 + params["bn1_beta"]
    w2f = params["conv2_w"] * s1[:, None, None, None]
    b2f = (params["conv2_b"] - params["bn1_mean"]) * s1 + params["bn1_beta"]
    if "ds_conv_w" in params:
        sd = params["ds_bn_gamma"] * jax.lax.rsqrt(params["ds_bn_var"] + eps)
        wdf = params["ds_conv_w"][:, :, 0, 0] * sd[:, None]
        bdf = (params["ds_conv_b"] - params["ds_bn_mean"]) * sd + params["ds_bn_beta"]
    else:
        wdf, bdf = None, None
    return w1f, b1f, w2f, b2f, wdf, bdf


# ----------------------------------------------------------------------------
# Fused residual-block kernel (NB images per grid step).
# conv = stacked im2col (9 shifted slices -> one (9*C, lanes) scratch) + 1 matmul.
# ----------------------------------------------------------------------------
def _make_block_kernel(NB, Cin, Cout, Wp, L1, Lout, has_downsample):
    taps = [dy * Wp + dx for dy in range(3) for dx in range(3)]
    id_start = 2 * (Wp + 1)            # identity-branch read offset into haloed x

    def kernel(x_ref, mask_ref, w1_ref, b1_ref, w2_ref, b2_ref, *rest):
        if has_downsample:
            wd_ref, bd_ref, o_ref, col1_ref, h1_ref, col2_ref = rest
        else:
            o_ref, col1_ref, h1_ref, col2_ref = rest

        for b in range(NB):
            # ---- conv1 (3x3, pad 1) + folded bn1 + ReLU, single K=9*Cin matmul.
            for t, s in enumerate(taps):
                col1_ref[t * Cin:(t + 1) * Cin, :] = x_ref[b, :, s:s + L1]
            h1 = jnp.dot(w1_ref[...], col1_ref[...],
                         preferred_element_type=jnp.float32)
            # mask zeroes padding positions so conv2 sees correct zero padding.
            h1 = jnp.maximum(h1 + b1_ref[...], 0.0) * mask_ref[...]
            h1_ref[...] = h1.astype(h1_ref.dtype)       # padded h1 stays in VMEM

            # ---- conv2 (3x3, pad 1) + folded bn1, single K=9*Cout matmul.
            for t, s in enumerate(taps):
                col2_ref[t * Cout:(t + 1) * Cout, :] = h1_ref[:, s:s + Lout]
            out = jnp.dot(w2_ref[...], col2_ref[...],
                          preferred_element_type=jnp.float32) + b2_ref[...]

            # ---- identity / 1x1-downsample branch, residual add, final ReLU.
            xs = x_ref[b, :, id_start:id_start + Lout]
            if has_downsample:
                ident = jnp.dot(wd_ref[...], xs,
                                preferred_element_type=jnp.float32) + bd_ref[...]
            else:
                ident = xs.astype(jnp.float32)
            o_ref[b, :, :] = jnp.maximum(out + ident, 0.0).astype(o_ref.dtype)

    return kernel


@jax.jit
def residual_block_2d_forward(x, params):
    """Forward pass of ResidualBlock2D (NCHW in / NCHW out)."""
    # TODO(synk): stride > 1 (strided convs + strided 1x1 downsample) not implemented.
    # TODO(synk): training-mode BatchNorm (batch statistics) not implemented.
    # TODO(synk): only activation='relu' (get_activation) is implemented.
    N, Cin, H, W = x.shape
    w1f, b1f, w2f, b2f, wdf, bdf = _fold_params(params)
    Cout = w1f.shape[0]
    has_ds = wdf is not None

    Hp, Wp = H + 2, W + 2
    L = Hp * Wp                                   # flattened zero-padded grid
    Lout = max(_round_up(H * Wp, 128), 128)       # lane-dense output span
    L1 = _round_up(2 * (Wp + 1) + Lout, 128)      # conv1-output / h1 span
    L2 = L1 + 2 * (Wp + 1)                        # haloed-input span

    # --- layout prep: bf16 first, spatial zero-pad, flatten, add a flat halo so
    #     every conv tap is a plain static slice.
    xb = x.astype(jnp.bfloat16)
    xpad = jnp.pad(xb, ((0, 0), (0, 0), (1, 1), (1, 1))).reshape(N, Cin, L)
    xflat = jnp.pad(xpad, ((0, 0), (0, 0), (Wp + 1, L2 - (Wp + 1) - L)))

    # mask of interior positions over the (extended) flattened padded grid
    pos = jnp.arange(L1)
    hp, wp_ = pos // Wp, pos % Wp
    mask = (((hp >= 1) & (hp <= H) & (wp_ >= 1) & (wp_ <= W))
            .astype(jnp.float32)[None, :])                       # (1, L1)

    # tap-stacked weights: column block t = dy*3+dx holds w[:, :, dy, dx]
    w1s = jnp.transpose(w1f, (0, 2, 3, 1)).reshape(Cout, 9 * Cin).astype(jnp.bfloat16)
    w2s = jnp.transpose(w2f, (0, 2, 3, 1)).reshape(Cout, 9 * Cout).astype(jnp.bfloat16)
    b1c = b1f.reshape(Cout, 1).astype(jnp.float32)
    b2c = b2f.reshape(Cout, 1).astype(jnp.float32)

    # batch blocking (NB images per grid step) to amortize per-step overhead
    per_img_bytes = Cin * L2 * 2 + Cout * Lout * 4
    NB = 1
    for cand in range(1, min(N, 8) + 1):
        if N % cand == 0 and cand * per_img_bytes <= (4 << 20):
            NB = cand

    kernel = _make_block_kernel(NB, Cin, Cout, Wp, L1, Lout, has_ds)

    inputs = [xflat, mask, w1s, b1c, w2s, b2c]
    in_specs = [
        pl.BlockSpec((NB, Cin, L2), lambda n: (n, 0, 0)),        # NB images per step
        pl.BlockSpec((1, L1), lambda n: (0, 0)),                 # mask (resident)
        pl.BlockSpec((Cout, 9 * Cin), lambda n: (0, 0)),         # conv1 taps (resident)
        pl.BlockSpec((Cout, 1), lambda n: (0, 0)),               # b1
        pl.BlockSpec((Cout, 9 * Cout), lambda n: (0, 0)),        # conv2 taps (resident)
        pl.BlockSpec((Cout, 1), lambda n: (0, 0)),               # b2
    ]
    if has_ds:
        inputs += [wdf.astype(jnp.bfloat16), bdf.reshape(Cout, 1).astype(jnp.float32)]
        in_specs += [pl.BlockSpec((Cout, Cin), lambda n: (0, 0)),
                     pl.BlockSpec((Cout, 1), lambda n: (0, 0))]

    flops = 2 * 9 * Cout * (Cin + Cout) * H * W * N
    if has_ds:
        flops += 2 * Cout * Cin * H * W * N
    bytes_accessed = (N * Cin * L2 * 2 + N * Cout * Lout * 4
                      + (9 * Cout * (Cin + Cout) + (Cout * Cin if has_ds else 0)) * 2)

    out_rows = pl.pallas_call(
        kernel,
        out_shape=jax.ShapeDtypeStruct((N, Cout, Lout), jnp.float32),
        grid_spec=pltpu.PrefetchScalarGridSpec(
            num_scalar_prefetch=0,
            grid=(N // NB,),
            in_specs=in_specs,
            out_specs=pl.BlockSpec((NB, Cout, Lout), lambda n: (n, 0, 0)),
            scratch_shapes=[
                pltpu.VMEM((9 * Cin, L1), jnp.bfloat16),    # conv1 im2col
                pltpu.VMEM((Cout, L1), jnp.bfloat16),       # padded h1
                pltpu.VMEM((9 * Cout, Lout), jnp.bfloat16), # conv2 im2col
            ],
        ),
        compiler_params=pltpu.CompilerParams(
            dimension_semantics=("parallel",),
            vmem_limit_bytes=48 * 1024 * 1024,
        ),
        cost_estimate=pl.CostEstimate(
            flops=flops, transcendentals=0, bytes_accessed=bytes_accessed),
    )(*inputs)

    # cheap un-flatten: lanes [0, H*Wp) are rows 1..H of the padded grid, each row
    # starting at padded col 1 -> slice, reshape to (H, Wp), drop the 2 pad cols.
    return out_rows[:, :, :H * Wp].reshape(N, Cout, H, Wp)[:, :, :, :W]


# ----------------------------------------------------------------------------
# Parameter construction mirroring the PyTorch module.
# ----------------------------------------------------------------------------
def init_residual_block_2d(key, in_channels, channels, stride=1):
    if stride != 1:
        raise NotImplementedError("Pallas ResidualBlock2D: stride > 1 not implemented")

    def conv_init(k, cout, cin, kh, kw):
        k_w, k_b = jax.random.split(k)
        bound = 1.0 / float(cin * kh * kw) ** 0.5
        w = jax.random.uniform(k_w, (cout, cin, kh, kw), jnp.float32, -bound, bound)
        b = jax.random.uniform(k_b, (cout,), jnp.float32, -bound, bound)
        return w, b

    def bn_init(k, c):
        k1, k2, k3, k4 = jax.random.split(k, 4)
        return (jax.random.uniform(k1, (c,), jnp.float32, 0.8, 1.2),   # gamma
                0.3 * jax.random.normal(k2, (c,), jnp.float32),        # beta
                0.3 * jax.random.normal(k3, (c,), jnp.float32),        # running mean
                jax.random.uniform(k4, (c,), jnp.float32, 0.8, 1.2))   # running var

    ks = jax.random.split(key, 6)
    p = {}
    p["conv1_w"], p["conv1_b"] = conv_init(ks[0], channels, in_channels, 3, 3)
    p["bn1_gamma"], p["bn1_beta"], p["bn1_mean"], p["bn1_var"] = bn_init(ks[1], channels)
    p["conv2_w"], p["conv2_b"] = conv_init(ks[2], channels, channels, 3, 3)
    # bn2 exists on the module but the original forward never uses it (applies bn1 twice).
    p["bn2_gamma"], p["bn2_beta"], p["bn2_mean"], p["bn2_var"] = bn_init(ks[3], channels)
    if in_channels != channels or stride != 1:
        p["ds_conv_w"], p["ds_conv_b"] = conv_init(ks[4], channels, in_channels, 1, 1)
        (p["ds_bn_gamma"], p["ds_bn_beta"],
         p["ds_bn_mean"], p["ds_bn_var"]) = bn_init(ks[5], channels)
    return p


# ----------------------------------------------------------------------------
# Pure-JAX reference that mirrors the kernel's bf16 storage / f32 accumulation.
# ----------------------------------------------------------------------------
def _reference_forward(x, params):
    bf = lambda a: a.astype(jnp.bfloat16).astype(jnp.float32)
    w1f, b1f, w2f, b2f, wdf, bdf = _fold_params(params)

    def conv3x3(z, w, b):
        y = jax.lax.conv_general_dilated(
            bf(z), bf(w), window_strides=(1, 1), padding=((1, 1), (1, 1)),
            dimension_numbers=("NCHW", "OIHW", "NCHW"))
        return y + b[None, :, None, None]

    h1 = jnp.maximum(conv3x3(x, w1f, b1f), 0.0)
    out = conv3x3(h1, w2f, b2f)
    if wdf is not None:
        ident = jnp.einsum("oc,nchw->nohw", bf(wdf), bf(x)) + bdf[None, :, None, None]
    else:
        ident = bf(x)
    return jnp.maximum(out + ident, 0.0)


if __name__ == "__main__":
    key = jax.random.PRNGKey(0)
    k_x, k_p = jax.random.split(key)

    # Small shapes: batch=2, in_channels=4, channels=8, spatial 16x16, stride=1
    x = jax.random.normal(k_x, (2, 4, 16, 16), jnp.float32)
    params = init_residual_block_2d(k_p, in_channels=4, channels=8, stride=1)

    out = residual_block_2d_forward(x, params)
    out = jax.block_until_ready(out)

    ref = _reference_forward(x, params)
    assert out.shape == (2, 8, 16, 16), out.shape
    err = float(jnp.max(jnp.abs(out - ref)))
    assert err < 1e-2, f"max abs error vs reference: {err}"
    print("KERNEL_OK")
</pallas_src>

<mosaic_0001>
module attributes {stable_mosaic.version = 11 : i64} {
  func.func @kernel(%arg0: i32, %arg1: memref<2x4x550xbf16, #tpu.memory_space<vmem>>, %arg2: memref<1x512xf32, #tpu.memory_space<vmem>>, %arg3: memref<8x36xbf16, #tpu.memory_space<vmem>>, %arg4: memref<8x1xf32, #tpu.memory_space<vmem>>, %arg5: memref<8x72xbf16, #tpu.memory_space<vmem>>, %arg6: memref<8x1xf32, #tpu.memory_space<vmem>>, %arg7: memref<8x4xbf16, #tpu.memory_space<vmem>>, %arg8: memref<8x1xf32, #tpu.memory_space<vmem>>, %arg9: memref<2x8x384xf32, #tpu.memory_space<vmem>>, %arg10: memref<36x512xbf16, #tpu.memory_space<vmem>>, %arg11: memref<8x512xbf16, #tpu.memory_space<vmem>>, %arg12: memref<72x384xbf16, #tpu.memory_space<vmem>>) attributes {dimension_semantics = [#tpu.dimension_semantics<parallel>], iteration_bounds = array<i64: 1>, scalar_prefetch = 0 : i64, scratch_operands = 3 : i64, tpu.core_type = #tpu.core_type<tc>, window_params = [{transform_indices = @transform_0, window_bounds = array<i64: 2, 4, 550>}, {pipeline_mode = #tpu.pipeline_mode<synchronous>, transform_indices = @transform_1, window_bounds = array<i64: 1, 512>}, {pipeline_mode = #tpu.pipeline_mode<synchronous>, transform_indices = @transform_2, window_bounds = array<i64: 8, 36>}, {pipeline_mode = #tpu.pipeline_mode<synchronous>, transform_indices = @transform_3, window_bounds = array<i64: 8, 1>}, {pipeline_mode = #tpu.pipeline_mode<synchronous>, transform_indices = @transform_4, window_bounds = array<i64: 8, 72>}, {pipeline_mode = #tpu.pipeline_mode<synchronous>, transform_indices = @transform_5, window_bounds = array<i64: 8, 1>}, {pipeline_mode = #tpu.pipeline_mode<synchronous>, transform_indices = @transform_6, window_bounds = array<i64: 8, 4>}, {pipeline_mode = #tpu.pipeline_mode<synchronous>, transform_indices = @transform_7, window_bounds = array<i64: 8, 1>}, {transform_indices = @transform_8, window_bounds = array<i64: 2, 8, 384>}]} {
    %c0 = arith.constant 0 : index
    %c0_0 = arith.constant 0 : index
    %c0_1 = arith.constant 0 : index
    %0 = vector.load %arg1[%c0, %c0_0, %c0_1] : memref<2x4x550xbf16, #tpu.memory_space<vmem>>, vector<1x4x512xbf16>
    %1 = vector.shape_cast %0 : vector<1x4x512xbf16> to vector<4x512xbf16>
    %c0_2 = arith.constant 0 : index
    %c0_3 = arith.constant 0 : index
    %2 = vector.load %arg10[%c0_2, %c0_3] : memref<36x512xbf16, #tpu.memory_space<vmem>>, vector<4x512xbf16>
    tpu.vector_store %arg10[%c0_2, %c0_3], %1 {strides = array<i32>} : memref<36x512xbf16, #tpu.memory_space<vmem>>, vector<4x512xbf16>,
    %c0_4 = arith.constant 0 : index
    %c0_5 = arith.constant 0 : index
    %c1 = arith.constant 1 : index
    %3 = vector.load %arg1[%c0_4, %c0_5, %c1] : memref<2x4x550xbf16, #tpu.memory_space<vmem>>, vector<1x4x512xbf16>
    %4 = vector.shape_cast %3 : vector<1x4x512xbf16> to vector<4x512xbf16>
    %c4 = arith.constant 4 : index
    %c0_6 = arith.constant 0 : index
    %5 = vector.load %arg10[%c4, %c0_6] : memref<36x512xbf16, #tpu.memory_space<vmem>>, vector<4x512xbf16>
    tpu.vector_store %arg10[%c4, %c0_6], %4 {strides = array<i32>} : memref<36x512xbf16, #tpu.memory_space<vmem>>, vector<4x512xbf16>,
    %c0_7 = arith.constant 0 : index
    %c0_8 = arith.constant 0 : index
    %c2 = arith.constant 2 : index
    %6 = vector.load %arg1[%c0_7, %c0_8, %c2] : memref<2x4x550xbf16, #tpu.memory_space<vmem>>, vector<1x4x512xbf16>
    %7 = vector.shape_cast %6 : vector<1x4x512xbf16> to vector<4x512xbf16>
    %c8 = arith.constant 8 : index
    %c0_9 = arith.constant 0 : index
    %8 = vector.load %arg10[%c8, %c0_9] : memref<36x512xbf16, #tpu.memory_space<vmem>>, vector<4x512xbf16>
    tpu.vector_store %arg10[%c8, %c0_9], %7 {strides = array<i32>} : memref<36x512xbf16, #tpu.memory_space<vmem>>, vector<4x512xbf16>,
    %c0_10 = arith.constant 0 : index
    %c0_11 = arith.constant 0 : index
    %c18 = arith.constant 18 : index
    %9 = vector.load %arg1[%c0_10, %c0_11, %c18] : memref<2x4x550xbf16, #tpu.memory_space<vmem>>, vector<1x4x512xbf16>
    %10 = vector.shape_cast %9 : vector<1x4x512xbf16> to vector<4x512xbf16>
    %c12 = arith.constant 12 : index
    %c0_12 = arith.constant 0 : index
    %11 = vector.load %arg10[%c12, %c0_12] : memref<36x512xbf16, #tpu.memory_space<vmem>>, vector<4x512xbf16>
    tpu.vector_store %arg10[%c12, %c0_12], %10 {strides = array<i32>} : memref<36x512xbf16, #tpu.memory_space<vmem>>, vector<4x512xbf16>,
    %c0_13 = arith.constant 0 : index
    %c0_14 = arith.constant 0 : index
    %c19 = arith.constant 19 : index
    %12 = vector.load %arg1[%c0_13, %c0_14, %c19] : memref<2x4x550xbf16, #tpu.memory_space<vmem>>, vector<1x4x512xbf16>
    %13 = vector.shape_cast %12 : vector<1x4x512xbf16> to vector<4x512xbf16>
    %c16 = arith.constant 16 : index
    %c0_15 = arith.constant 0 : index
    %14 = vector.load %arg10[%c16, %c0_15] : memref<36x512xbf16, #tpu.memory_space<vmem>>, vector<4x512xbf16>
    tpu.vector_store %arg10[%c16, %c0_15], %13 {strides = array<i32>} : memref<36x512xbf16, #tpu.memory_space<vmem>>, vector<4x512xbf16>,
    %c0_16 = arith.constant 0 : index
    %c0_17 = arith.constant 0 : index
    %c20 = arith.constant 20 : index
    %15 = vector.load %arg1[%c0_16, %c0_17, %c20] : memref<2x4x550xbf16, #tpu.memory_space<vmem>>, vector<1x4x512xbf16>
    %16 = vector.shape_cast %15 : vector<1x4x512xbf16> to vector<4x512xbf16>
    %c20_18 = arith.constant 20 : index
    %c0_19 = arith.constant 0 : index
    %17 = vector.load %arg10[%c20_18, %c0_19] : memref<36x512xbf16, #tpu.memory_space<vmem>>, vector<4x512xbf16>
    tpu.vector_store %arg10[%c20_18, %c0_19], %16 {strides = array<i32>} : memref<36x512xbf16, #tpu.memory_space<vmem>>, vector<4x512xbf16>,
    %c0_20 = arith.constant 0 : index
    %c0_21 = arith.constant 0 : index
    %c36 = arith.constant 36 : index
    %18 = vector.load %arg1[%c0_20, %c0_21, %c36] : memref<2x4x550xbf16, #tpu.memory_space<vmem>>, vector<1x4x512xbf16>
    %19 = vector.shape_cast %18 : vector<1x4x512xbf16> to vector<4x512xbf16>
    %c24 = arith.constant 24 : index
    %c0_22 = arith.constant 0 : index
    %20 = vector.load %arg10[%c24, %c0_22] : memref<36x512xbf16, #tpu.memory_space<vmem>>, vector<4x512xbf16>
    tpu.vector_store %arg10[%c24, %c0_22], %19 {strides = array<i32>} : memref<36x512xbf16, #tpu.memory_space<vmem>>, vector<4x512xbf16>,
    %c0_23 = arith.constant 0 : index
    %c0_24 = arith.constant 0 : index
    %c37 = arith.constant 37 : index
    %21 = vector.load %arg1[%c0_23, %c0_24, %c37] : memref<2x4x550xbf16, #tpu.memory_space<vmem>>, vector<1x4x512xbf16>
    %22 = vector.shape_cast %21 : vector<1x4x512xbf16> to vector<4x512xbf16>
    %c28 = arith.constant 28 : index
    %c0_25 = arith.constant 0 : index
    %23 = vector.load %arg10[%c28, %c0_25] : memref<36x512xbf16, #tpu.memory_space<vmem>>, vector<4x512xbf16>
    tpu.vector_store %arg10[%c28, %c0_25], %22 {strides = array<i32>} : memref<36x512xbf16, #tpu.memory_space<vmem>>, vector<4x512xbf16>,
    %c0_26 = arith.constant 0 : index
    %c0_27 = arith.constant 0 : index
    %c38 = arith.constant 38 : index
    %24 = vector.load %arg1[%c0_26, %c0_27, %c38] : memref<2x4x550xbf16, #tpu.memory_space<vmem>>, vector<1x4x512xbf16>
    %25 = vector.shape_cast %24 : vector<1x4x512xbf16> to vector<4x512xbf16>
    %c32 = arith.constant 32 : index
    %c0_28 = arith.constant 0 : index
    %26 = vector.load %arg10[%c32, %c0_28] : memref<36x512xbf16, #tpu.memory_space<vmem>>, vector<4x512xbf16>
    tpu.vector_store %arg10[%c32, %c0_28], %25 {strides = array<i32>} : memref<36x512xbf16, #tpu.memory_space<vmem>>, vector<4x512xbf16>,
    %c0_29 = arith.constant 0 : index
    %c0_30 = arith.constant 0 : index
    %27 = vector.load %arg3[%c0_29, %c0_30] : memref<8x36xbf16, #tpu.memory_space<vmem>>, vector<8x36xbf16>
    %c0_31 = arith.constant 0 : index
    %c0_32 = arith.constant 0 : index
    %28 = vector.load %arg10[%c0_31, %c0_32] : memref<36x512xbf16, #tpu.memory_space<vmem>>, vector<36x512xbf16>
    %cst = arith.constant dense<0.000000e+00> : vector<8x512xf32>
    %29 = tpu.matmul %27, %28, %cst {dimension_numbers = #tpu.dot_dimension_numbers<[1], [0], [0], [1], [0, 0, 1, 1], [], []>} : vector<8x36xbf16>, vector<36x512xbf16>, vector<8x512xf32> -> vector<8x512xf32>
    %c0_33 = arith.constant 0 : index
    %c0_34 = arith.constant 0 : index
    %30 = vector.load %arg4[%c0_33, %c0_34] : memref<8x1xf32, #tpu.memory_space<vmem>>, vector<8x1xf32>
    %31 = vector.broadcast %30 : vector<8x1xf32> to vector<8x512xf32>
    %32 = arith.addf %29, %31 : vector<8x512xf32>
    %cst_35 = arith.constant 0.000000e+00 : f32
    %33 = vector.broadcast %cst_35 : f32 to vector<8x512xf32>
    %34 = arith.maximumf %32, %33 : vector<8x512xf32>
    %c0_36 = arith.constant 0 : index
    %c0_37 = arith.constant 0 : index
    %35 = vector.load %arg2[%c0_36, %c0_37] : memref<1x512xf32, #tpu.memory_space<vmem>>, vector<1x512xf32>
    %36 = vector.broadcast %35 : vector<1x512xf32> to vector<8x512xf32>
    %37 = arith.mulf %34, %36 : vector<8x512xf32>
    %38 = arith.truncf %37 : vector<8x512xf32> to vector<8x512xbf16>
    %c0_38 = arith.constant 0 : index
    %c0_39 = arith.constant 0 : index
    %39 = vector.load %arg11[%c0_38, %c0_39] : memref<8x512xbf16, #tpu.memory_space<vmem>>, vector<8x512xbf16>
    tpu.vector_store %arg11[%c0_38, %c0_39], %38 {strides = array<i32>} : memref<8x512xbf16, #tpu.memory_space<vmem>>, vector<8x512xbf16>,
    %c0_40 = arith.constant 0 : index
    %c0_41 = arith.constant 0 : index
    %40 = vector.load %arg11[%c0_40, %c0_41] : memref<8x512xbf16, #tpu.memory_space<vmem>>, vector<8x384xbf16>
    %c0_42 = arith.constant 0 : index
    %c0_43 = arith.constant 0 : index
    %41 = vector.load %arg12[%c0_42, %c0_43] : memref<72x384xbf16, #tpu.memory_space<vmem>>, vector<8x384xbf16>
    tpu.vector_store %arg12[%c0_42, %c0_43], %40 {strides = array<i32>} : memref<72x384xbf16, #tpu.memory_space<vmem>>, vector<8x384xbf16>,
    %c0_44 = arith.constant 0 : index
    %c1_45 = arith.constant 1 : index
    %42 = vector.load %arg11[%c0_44, %c1_45] : memref<8x512xbf16, #tpu.memory_space<vmem>>, vector<8x384xbf16>
    %c8_46 = arith.constant 8 : index
    %c0_47 = arith.constant 0 : index
    %43 = vector.load %arg12[%c8_46, %c0_47] : memref<72x384xbf16, #tpu.memory_space<vmem>>, vector<8x384xbf16>
    tpu.vector_store %arg12[%c8_46, %c0_47], %42 {strides = array<i32>} : memref<72x384xbf16, #tpu.memory_space<vmem>>, vector<8x384xbf16>,
    %c0_48 = arith.constant 0 : index
    %c2_49 = arith.constant 2 : index
    %44 = vector.load %arg11[%c0_48, %c2_49] : memref<8x512xbf16, #tpu.memory_space<vmem>>, vector<8x384xbf16>
    %c16_50 = arith.constant 16 : index
    %c0_51 = arith.constant 0 : index
    %45 = vector.load %arg12[%c16_50, %c0_51] : memref<72x384xbf16, #tpu.memory_space<vmem>>, vector<8x384xbf16>
    tpu.vector_store %arg12[%c16_50, %c0_51], %44 {strides = array<i32>} : memref<72x384xbf16, #tpu.memory_space<vmem>>, vector<8x384xbf16>,
    %c0_52 = arith.constant 0 : index
    %c18_53 = arith.constant 18 : index
    %46 = vector.load %arg11[%c0_52, %c18_53] : memref<8x512xbf16, #tpu.memory_space<vmem>>, vector<8x384xbf16>
    %c24_54 = arith.constant 24 : index
    %c0_55 = arith.constant 0 : index
    %47 = vector.load %arg12[%c24_54, %c0_55] : memref<72x384xbf16, #tpu.memory_space<vmem>>, vector<8x384xbf16>
    tpu.vector_store %arg12[%c24_54, %c0_55], %46 {strides = array<i32>} : memref<72x384xbf16, #tpu.memory_space<vmem>>, vector<8x384xbf16>,
    %c0_56 = arith.constant 0 : index
    %c19_57 = arith.constant 19 : index
    %48 = vector.load %arg11[%c0_56, %c19_57] : memref<8x512xbf16, #tpu.memory_space<vmem>>, vector<8x384xbf16>
    %c32_58 = arith.constant 32 : index
    %c0_59 = arith.constant 0 : index
    %49 = vector.load %arg12[%c32_58, %c0_59] : memref<72x384xbf16, #tpu.memory_space<vmem>>, vector<8x384xbf16>
    tpu.vector_store %arg12[%c32_58, %c0_59], %48 {strides = array<i32>} : memref<72x384xbf16, #tpu.memory_space<vmem>>, vector<8x384xbf16>,
    %c0_60 = arith.constant 0 : index
    %c20_61 = arith.constant 20 : index
    %50 = vector.load %arg11[%c0_60, %c20_61] : memref<8x512xbf16, #tpu.memory_space<vmem>>, vector<8x384xbf16>
    %c40 = arith.constant 40 : index
    %c0_62 = arith.constant 0 : index
    %51 = vector.load %arg12[%c40, %c0_62] : memref<72x384xbf16, #tpu.memory_space<vmem>>, vector<8x384xbf16>
    tpu.vector_store %arg12[%c40, %c0_62], %50 {strides = array<i32>} : memref<72x384xbf16, #tpu.memory_space<vmem>>, vector<8x384xbf16>,
    %c0_63 = arith.constant 0 : index
    %c36_64 = arith.constant 36 : index
    %52 = vector.load %arg11[%c0_63, %c36_64] : memref<8x512xbf16, #tpu.memory_space<vmem>>, vector<8x384xbf16>
    %c48 = arith.constant 48 : index
    %c0_65 = arith.constant 0 : index
    %53 = vector.load %arg12[%c48, %c0_65] : memref<72x384xbf16, #tpu.memory_space<vmem>>, vector<8x384xbf16>
    tpu.vector_store %arg12[%c48, %c0_65], %52 {strides = array<i32>} : memref<72x384xbf16, #tpu.memory_space<vmem>>, vector<8x384xbf16>,
    %c0_66 = arith.constant 0 : index
    %c37_67 = arith.constant 37 : index
    %54 = vector.load %arg11[%c0_66, %c37_67] : memref<8x512xbf16, #tpu.memory_space<vmem>>, vector<8x384xbf16>
    %c56 = arith.constant 56 : index
    %c0_68 = arith.constant 0 : index
    %55 = vector.load %arg12[%c56, %c0_68] : memref<72x384xbf16, #tpu.memory_space<vmem>>, vector<8x384xbf16>
    tpu.vector_store %arg12[%c56, %c0_68], %54 {strides = array<i32>} : memref<72x384xbf16, #tpu.memory_space<vmem>>, vector<8x384xbf16>,
    %c0_69 = arith.constant 0 : index
    %c38_70 = arith.constant 38 : index
    %56 = vector.load %arg11[%c0_69, %c38_70] : memref<8x512xbf16, #tpu.memory_space<vmem>>, vector<8x384xbf16>
    %c64 = arith.constant 64 : index
    %c0_71 = arith.constant 0 : index
    %57 = vector.load %arg12[%c64, %c0_71] : memref<72x384xbf16, #tpu.memory_space<vmem>>, vector<8x384xbf16>
    tpu.vector_store %arg12[%c64, %c0_71], %56 {strides = array<i32>} : memref<72x384xbf16, #tpu.memory_space<vmem>>, vector<8x384xbf16>,
    %c0_72 = arith.constant 0 : index
    %c0_73 = arith.constant 0 : index
    %58 = vector.load %arg5[%c0_72, %c0_73] : memref<8x72xbf16, #tpu.memory_space<vmem>>, vector<8x72xbf16>
    %c0_74 = arith.constant 0 : index
    %c0_75 = arith.constant 0 : index
    %59 = vector.load %arg12[%c0_74, %c0_75] : memref<72x384xbf16, #tpu.memory_space<vmem>>, vector<72x384xbf16>
    %cst_76 = arith.constant dense<0.000000e+00> : vector<8x384xf32>
    %60 = tpu.matmul %58, %59, %cst_76 {dimension_numbers = #tpu.dot_dimension_numbers<[1], [0], [0], [1], [0, 0, 1, 1], [], []>} : vector<8x72xbf16>, vector<72x384xbf16>, vector<8x384xf32> -> vector<8x384xf32>
    %c0_77 = arith.constant 0 : index
    %c0_78 = arith.constant 0 : index
    %61 = vector.load %arg6[%c0_77, %c0_78] : memref<8x1xf32, #tpu.memory_space<vmem>>, vector<8x1xf32>
    %62 = vector.broadcast %61 : vector<8x1xf32> to vector<8x384xf32>
    %63 = arith.addf %60, %62 : vector<8x384xf32>
    %c0_79 = arith.constant 0 : index
    %c0_80 = arith.constant 0 : index
    %c38_81 = arith.constant 38 : index
    %64 = vector.load %arg1[%c0_79, %c0_80, %c38_81] : memref<2x4x550xbf16, #tpu.memory_space<vmem>>, vector<1x4x384xbf16>
    %65 = vector.shape_cast %64 : vector<1x4x384xbf16> to vector<4x384xbf16>
    %c0_82 = arith.constant 0 : index
    %c0_83 = arith.constant 0 : index
    %66 = vector.load %arg7[%c0_82, %c0_83] : memref<8x4xbf16, #tpu.memory_space<vmem>>, vector<8x4xbf16>
    %cst_84 = arith.constant dense<0.000000e+00> : vector<8x384xf32>
    %67 = tpu.matmul %66, %65, %cst_84 {dimension_numbers = #tpu.dot_dimension_numbers<[1], [0], [0], [1], [0, 0, 1, 1], [], []>} : vector<8x4xbf16>, vector<4x384xbf16>, vector<8x384xf32> -> vector<8x384xf32>
    %c0_85 = arith.constant 0 : index
    %c0_86 = arith.constant 0 : index
    %68 = vector.load %arg8[%c0_85, %c0_86] : memref<8x1xf32, #tpu.memory_space<vmem>>, vector<8x1xf32>
    %69 = vector.broadcast %68 : vector<8x1xf32> to vector<8x384xf32>
    %70 = arith.addf %67, %69 : vector<8x384xf32>
    %71 = arith.addf %63, %70 : vector<8x384xf32>
    %cst_87 = arith.constant 0.000000e+00 : f32
    %72 = vector.broadcast %cst_87 : f32 to vector<8x384xf32>
    %73 = arith.maximumf %71, %72 : vector<8x384xf32>
    %c0_88 = arith.constant 0 : index
    %c0_89 = arith.constant 0 : index
    %c0_90 = arith.constant 0 : index
    %74 = vector.load %arg9[%c0_88, %c0_89, %c0_90] : memref<2x8x384xf32, #tpu.memory_space<vmem>>, vector<1x8x384xf32>
    %75 = vector.shape_cast %74 : vector<1x8x384xf32> to vector<8x384xf32>
    %76 = vector.shape_cast %73 : vector<8x384xf32> to vector<1x8x384xf32>
    tpu.vector_store %arg9[%c0_88, %c0_89, %c0_90], %76 {strides = array<i32>} : memref<2x8x384xf32, #tpu.memory_space<vmem>>, vector<1x8x384xf32>,
    %c1_91 = arith.constant 1 : index
    %c0_92 = arith.constant 0 : index
    %c0_93 = arith.constant 0 : index
    %77 = vector.load %arg1[%c1_91, %c0_92, %c0_93] : memref<2x4x550xbf16, #tpu.memory_space<vmem>>, vector<1x4x512xbf16>
    %78 = vector.shape_cast %77 : vector<1x4x512xbf16> to vector<4x512xbf16>
    %c0_94 = arith.constant 0 : index
    %c0_95 = arith.constant 0 : index
    %79 = vector.load %arg10[%c0_94, %c0_95] : memref<36x512xbf16, #tpu.memory_space<vmem>>, vector<4x512xbf16>
    tpu.vector_store %arg10[%c0_94, %c0_95], %78 {strides = array<i32>} : memref<36x512xbf16, #tpu.memory_space<vmem>>, vector<4x512xbf16>,
    %c1_96 = arith.constant 1 : index
    %c0_97 = arith.constant 0 : index
    %c1_98 = arith.constant 1 : index
    %80 = vector.load %arg1[%c1_96, %c0_97, %c1_98] : memref<2x4x550xbf16, #tpu.memory_space<vmem>>, vector<1x4x512xbf16>
    %81 = vector.shape_cast %80 : vector<1x4x512xbf16> to vector<4x512xbf16>
    %c4_99 = arith.constant 4 : index
    %c0_100 = arith.constant 0 : index
    %82 = vector.load %arg10[%c4_99, %c0_100] : memref<36x512xbf16, #tpu.memory_space<vmem>>, vector<4x512xbf16>
    tpu.vector_store %arg10[%c4_99, %c0_100], %81 {strides = array<i32>} : memref<36x512xbf16, #tpu.memory_space<vmem>>, vector<4x512xbf16>,
    %c1_101 = arith.constant 1 : index
    %c0_102 = arith.constant 0 : index
    %c2_103 = arith.constant 2 : index
    %83 = vector.load %arg1[%c1_101, %c0_102, %c2_103] : memref<2x4x550xbf16, #tpu.memory_space<vmem>>, vector<1x4x512xbf16>
    %84 = vector.shape_cast %83 : vector<1x4x512xbf16> to vector<4x512xbf16>
    %c8_104 = arith.constant 8 : index
    %c0_105 = arith.constant 0 : index
    %85 = vector.load %arg10[%c8_104, %c0_105] : memref<36x512xbf16, #tpu.memory_space<vmem>>, vector<4x512xbf16>
    tpu.vector_store %arg10[%c8_104, %c0_105], %84 {strides = array<i32>} : memref<36x512xbf16, #tpu.memory_space<vmem>>, vector<4x512xbf16>,
    %c1_106 = arith.constant 1 : index
    %c0_107 = arith.constant 0 : index
    %c18_108 = arith.constant 18 : index
    %86 = vector.load %arg1[%c1_106, %c0_107, %c18_108] : memref<2x4x550xbf16, #tpu.memory_space<vmem>>, vector<1x4x512xbf16>
    %87 = vector.shape_cast %86 : vector<1x4x512xbf16> to vector<4x512xbf16>
    %c12_109 = arith.constant 12 : index
    %c0_110 = arith.constant 0 : index
    %88 = vector.load %arg10[%c12_109, %c0_110] : memref<36x512xbf16, #tpu.memory_space<vmem>>, vector<4x512xbf16>
    tpu.vector_store %arg10[%c12_109, %c0_110], %87 {strides = array<i32>} : memref<36x512xbf16, #tpu.memory_space<vmem>>, vector<4x512xbf16>,
    %c1_111 = arith.constant 1 : index
    %c0_112 = arith.constant 0 : index
    %c19_113 = arith.constant 19 : index
    %89 = vector.load %arg1[%c1_111, %c0_112, %c19_113] : memref<2x4x550xbf16, #tpu.memory_space<vmem>>, vector<1x4x512xbf16>
    %90 = vector.shape_cast %89 : vector<1x4x512xbf16> to vector<4x512xbf16>
    %c16_114 = arith.constant 16 : index
    %c0_115 = arith.constant 0 : index
    %91 = vector.load %arg10[%c16_114, %c0_115] : memref<36x512xbf16, #tpu.memory_space<vmem>>, vector<4x512xbf16>
    tpu.vector_store %arg10[%c16_114, %c0_115], %90 {strides = array<i32>} : memref<36x512xbf16, #tpu.memory_space<vmem>>, vector<4x512xbf16>,
    %c1_116 = arith.constant 1 : index
    %c0_117 = arith.constant 0 : index
    %c20_118 = arith.constant 20 : index
    %92 = vector.load %arg1[%c1_116, %c0_117, %c20_118] : memref<2x4x550xbf16, #tpu.memory_space<vmem>>, vector<1x4x512xbf16>
    %93 = vector.shape_cast %92 : vector<1x4x512xbf16> to vector<4x512xbf16>
    %c20_119 = arith.constant 20 : index
    %c0_120 = arith.constant 0 : index
    %94 = vector.load %arg10[%c20_119, %c0_120] : memref<36x512xbf16, #tpu.memory_space<vmem>>, vector<4x512xbf16>
    tpu.vector_store %arg10[%c20_119, %c0_120], %93 {strides = array<i32>} : memref<36x512xbf16, #tpu.memory_space<vmem>>, vector<4x512xbf16>,
    %c1_121 = arith.constant 1 : index
    %c0_122 = arith.constant 0 : index
    %c36_123 = arith.constant 36 : index
    %95 = vector.load %arg1[%c1_121, %c0_122, %c36_123] : memref<2x4x550xbf16, #tpu.memory_space<vmem>>, vector<1x4x512xbf16>
    %96 = vector.shape_cast %95 : vector<1x4x512xbf16> to vector<4x512xbf16>
    %c24_124 = arith.constant 24 : index
    %c0_125 = arith.constant 0 : index
    %97 = vector.load %arg10[%c24_124, %c0_125] : memref<36x512xbf16, #tpu.memory_space<vmem>>, vector<4x512xbf16>
    tpu.vector_store %arg10[%c24_124, %c0_125], %96 {strides = array<i32>} : memref<36x512xbf16, #tpu.memory_space<vmem>>, vector<4x512xbf16>,
    %c1_126 = arith.constant 1 : index
    %c0_127 = arith.constant 0 : index
    %c37_128 = arith.constant 37 : index
    %98 = vector.load %arg1[%c1_126, %c0_127, %c37_128] : memref<2x4x550xbf16, #tpu.memory_space<vmem>>, vector<1x4x512xbf16>
    %99 = vector.shape_cast %98 : vector<1x4x512xbf16> to vector<4x512xbf16>
    %c28_129 = arith.constant 28 : index
    %c0_130 = arith.constant 0 : index
    %100 = vector.load %arg10[%c28_129, %c0_130] : memref<36x512xbf16, #tpu.memory_space<vmem>>, vector<4x512xbf16>
    tpu.vector_store %arg10[%c28_129, %c0_130], %99 {strides = array<i32>} : memref<36x512xbf16, #tpu.memory_space<vmem>>, vector<4x512xbf16>,
    %c1_131 = arith.constant 1 : index
    %c0_132 = arith.constant 0 : index
    %c38_133 = arith.constant 38 : index
    %101 = vector.load %arg1[%c1_131, %c0_132, %c38_133] : memref<2x4x550xbf16, #tpu.memory_space<vmem>>, vector<1x4x512xbf16>
    %102 = vector.shape_cast %101 : vector<1x4x512xbf16> to vector<4x512xbf16>
    %c32_134 = arith.constant 32 : index
    %c0_135 = arith.constant 0 : index
    %103 = vector.load %arg10[%c32_134, %c0_135] : memref<36x512xbf16, #tpu.memory_space<vmem>>, vector<4x512xbf16>
    tpu.vector_store %arg10[%c32_134, %c0_135], %102 {strides = array<i32>} : memref<36x512xbf16, #tpu.memory_space<vmem>>, vector<4x512xbf16>,
    %c0_136 = arith.constant 0 : index
    %c0_137 = arith.constant 0 : index
    %104 = vector.load %arg3[%c0_136, %c0_137] : memref<8x36xbf16, #tpu.memory_space<vmem>>, vector<8x36xbf16>
    %c0_138 = arith.constant 0 : index
    %c0_139 = arith.constant 0 : index
    %105 = vector.load %arg10[%c0_138, %c0_139] : memref<36x512xbf16, #tpu.memory_space<vmem>>, vector<36x512xbf16>
    %cst_140 = arith.constant dense<0.000000e+00> : vector<8x512xf32>
    %106 = tpu.matmul %104, %105, %cst_140 {dimension_numbers = #tpu.dot_dimension_numbers<[1], [0], [0], [1], [0, 0, 1, 1], [], []>} : vector<8x36xbf16>, vector<36x512xbf16>, vector<8x512xf32> -> vector<8x512xf32>
    %c0_141 = arith.constant 0 : index
    %c0_142 = arith.constant 0 : index
    %107 = vector.load %arg4[%c0_141, %c0_142] : memref<8x1xf32, #tpu.memory_space<vmem>>, vector<8x1xf32>
    %108 = vector.broadcast %107 : vector<8x1xf32> to vector<8x512xf32>
    %109 = arith.addf %106, %108 : vector<8x512xf32>
    %cst_143 = arith.constant 0.000000e+00 : f32
    %110 = vector.broadcast %cst_143 : f32 to vector<8x512xf32>
    %111 = arith.maximumf %109, %110 : vector<8x512xf32>
    %c0_144 = arith.constant 0 : index
    %c0_145 = arith.constant 0 : index
    %112 = vector.load %arg2[%c0_144, %c0_145] : memref<1x512xf32, #tpu.memory_space<vmem>>, vector<1x512xf32>
    %113 = vector.broadcast %112 : vector<1x512xf32> to vector<8x512xf32>
    %114 = arith.mulf %111, %113 : vector<8x512xf32>
    %115 = arith.truncf %114 : vector<8x512xf32> to vector<8x512xbf16>
    %c0_146 = arith.constant 0 : index
    %c0_147 = arith.constant 0 : index
    %116 = vector.load %arg11[%c0_146, %c0_147] : memref<8x512xbf16, #tpu.memory_space<vmem>>, vector<8x512xbf16>
    tpu.vector_store %arg11[%c0_146, %c0_147], %115 {strides = array<i32>} : memref<8x512xbf16, #tpu.memory_space<vmem>>, vector<8x512xbf16>,
    %c0_148 = arith.constant 0 : index
    %c0_149 = arith.constant 0 : index
    %117 = vector.load %arg11[%c0_148, %c0_149] : memref<8x512xbf16, #tpu.memory_space<vmem>>, vector<8x384xbf16>
    %c0_150 = arith.constant 0 : index
    %c0_151 = arith.constant 0 : index
    %118 = vector.load %arg12[%c0_150, %c0_151] : memref<72x384xbf16, #tpu.memory_space<vmem>>, vector<8x384xbf16>
    tpu.vector_store %arg12[%c0_150, %c0_151], %117 {strides = array<i32>} : memref<72x384xbf16, #tpu.memory_space<vmem>>, vector<8x384xbf16>,
    %c0_152 = arith.constant 0 : index
    %c1_153 = arith.constant 1 : index
    %119 = vector.load %arg11[%c0_152, %c1_153] : memref<8x512xbf16, #tpu.memory_space<vmem>>, vector<8x384xbf16>
    %c8_154 = arith.constant 8 : index
    %c0_155 = arith.constant 0 : index
    %120 = vector.load %arg12[%c8_154, %c0_155] : memref<72x384xbf16, #tpu.memory_space<vmem>>, vector<8x384xbf16>
    tpu.vector_store %arg12[%c8_154, %c0_155], %119 {strides = array<i32>} : memref<72x384xbf16, #tpu.memory_space<vmem>>, vector<8x384xbf16>,
    %c0_156 = arith.constant 0 : index
    %c2_157 = arith.constant 2 : index
    %121 = vector.load %arg11[%c0_156, %c2_157] : memref<8x512xbf16, #tpu.memory_space<vmem>>, vector<8x384xbf16>
    %c16_158 = arith.constant 16 : index
    %c0_159 = arith.constant 0 : index
    %122 = vector.load %arg12[%c16_158, %c0_159] : memref<72x384xbf16, #tpu.memory_space<vmem>>, vector<8x384xbf16>
    tpu.vector_store %arg12[%c16_158, %c0_159], %121 {strides = array<i32>} : memref<72x384xbf16, #tpu.memory_space<vmem>>, vector<8x384xbf16>,
    %c0_160 = arith.constant 0 : index
    %c18_161 = arith.constant 18 : index
    %123 = vector.load %arg11[%c0_160, %c18_161] : memref<8x512xbf16, #tpu.memory_space<vmem>>, vector<8x384xbf16>
    %c24_162 = arith.constant 24 : index
    %c0_163 = arith.constant 0 : index
    %124 = vector.load %arg12[%c24_162, %c0_163] : memref<72x384xbf16, #tpu.memory_space<vmem>>, vector<8x384xbf16>
    tpu.vector_store %arg12[%c24_162, %c0_163], %123 {strides = array<i32>} : memref<72x384xbf16, #tpu.memory_space<vmem>>, vector<8x384xbf16>,
    %c0_164 = arith.constant 0 : index
    %c19_165 = arith.constant 19 : index
    %125 = vector.load %arg11[%c0_164, %c19_165] : memref<8x512xbf16, #tpu.memory_space<vmem>>, vector<8x384xbf16>
    %c32_166 = arith.constant 32 : index
    %c0_167 = arith.constant 0 : index
    %126 = vector.load %arg12[%c32_166, %c0_167] : memref<72x384xbf16, #tpu.memory_space<vmem>>, vector<8x384xbf16>
    tpu.vector_store %arg12[%c32_166, %c0_167], %125 {strides = array<i32>} : memref<72x384xbf16, #tpu.memory_space<vmem>>, vector<8x384xbf16>,
    %c0_168 = arith.constant 0 : index
    %c20_169 = arith.constant 20 : index
    %127 = vector.load %arg11[%c0_168, %c20_169] : memref<8x512xbf16, #tpu.memory_space<vmem>>, vector<8x384xbf16>
    %c40_170 = arith.constant 40 : index
    %c0_171 = arith.constant 0 : index
    %128 = vector.load %arg12[%c40_170, %c0_171] : memref<72x384xbf16, #tpu.memory_space<vmem>>, vector<8x384xbf16>
    tpu.vector_store %arg12[%c40_170, %c0_171], %127 {strides = array<i32>} : memref<72x384xbf16, #tpu.memory_space<vmem>>, vector<8x384xbf16>,
    %c0_172 = arith.constant 0 : index
    %c36_173 = arith.constant 36 : index
    %129 = vector.load %arg11[%c0_172, %c36_173] : memref<8x512xbf16, #tpu.memory_space<vmem>>, vector<8x384xbf16>
    %c48_174 = arith.constant 48 : index
    %c0_175 = arith.constant 0 : index
    %130 = vector.load %arg12[%c48_174, %c0_175] : memref<72x384xbf16, #tpu.memory_space<vmem>>, vector<8x384xbf16>
    tpu.vector_store %arg12[%c48_174, %c0_175], %129 {strides = array<i32>} : memref<72x384xbf16, #tpu.memory_space<vmem>>, vector<8x384xbf16>,
    %c0_176 = arith.constant 0 : index
    %c37_177 = arith.constant 37 : index
    %131 = vector.load %arg11[%c0_176, %c37_177] : memref<8x512xbf16, #tpu.memory_space<vmem>>, vector<8x384xbf16>
    %c56_178 = arith.constant 56 : index
    %c0_179 = arith.constant 0 : index
    %132 = vector.load %arg12[%c56_178, %c0_179] : memref<72x384xbf16, #tpu.memory_space<vmem>>, vector<8x384xbf16>
    tpu.vector_store %arg12[%c56_178, %c0_179], %131 {strides = array<i32>} : memref<72x384xbf16, #tpu.memory_space<vmem>>, vector<8x384xbf16>,
    %c0_180 = arith.constant 0 : index
    %c38_181 = arith.constant 38 : index
    %133 = vector.load %arg11[%c0_180, %c38_181] : memref<8x512xbf16, #tpu.memory_space<vmem>>, vector<8x384xbf16>
    %c64_182 = arith.constant 64 : index
    %c0_183 = arith.constant 0 : index
    %134 = vector.load %arg12[%c64_182, %c0_183] : memref<72x384xbf16, #tpu.memory_space<vmem>>, vector<8x384xbf16>
    tpu.vector_store %arg12[%c64_182, %c0_183], %133 {strides = array<i32>} : memref<72x384xbf16, #tpu.memory_space<vmem>>, vector<8x384xbf16>,
    %c0_184 = arith.constant 0 : index
    %c0_185 = arith.constant 0 : index
    %135 = vector.load %arg5[%c0_184, %c0_185] : memref<8x72xbf16, #tpu.memory_space<vmem>>, vector<8x72xbf16>
    %c0_186 = arith.constant 0 : index
    %c0_187 = arith.constant 0 : index
    %136 = vector.load %arg12[%c0_186, %c0_187] : memref<72x384xbf16, #tpu.memory_space<vmem>>, vector<72x384xbf16>
    %cst_188 = arith.constant dense<0.000000e+00> : vector<8x384xf32>
    %137 = tpu.matmul %135, %136, %cst_188 {dimension_numbers = #tpu.dot_dimension_numbers<[1], [0], [0], [1], [0, 0, 1, 1], [], []>} : vector<8x72xbf16>, vector<72x384xbf16>, vector<8x384xf32> -> vector<8x384xf32>
    %c0_189 = arith.constant 0 : index
    %c0_190 = arith.constant 0 : index
    %138 = vector.load %arg6[%c0_189, %c0_190] : memref<8x1xf32, #tpu.memory_space<vmem>>, vector<8x1xf32>
    %139 = vector.broadcast %138 : vector<8x1xf32> to vector<8x384xf32>
    %140 = arith.addf %137, %139 : vector<8x384xf32>
    %c1_191 = arith.constant 1 : index
    %c0_192 = arith.constant 0 : index
    %c38_193 = arith.constant 38 : index
    %141 = vector.load %arg1[%c1_191, %c0_192, %c38_193] : memref<2x4x550xbf16, #tpu.memory_space<vmem>>, vector<1x4x384xbf16>
    %142 = vector.shape_cast %141 : vector<1x4x384xbf16> to vector<4x384xbf16>
    %c0_194 = arith.constant 0 : index
    %c0_195 = arith.constant 0 : index
    %143 = vector.load %arg7[%c0_194, %c0_195] : memref<8x4xbf16, #tpu.memory_space<vmem>>, vector<8x4xbf16>
    %cst_196 = arith.constant dense<0.000000e+00> : vector<8x384xf32>
    %144 = tpu.matmul %143, %142, %cst_196 {dimension_numbers = #tpu.dot_dimension_numbers<[1], [0], [0], [1], [0, 0, 1, 1], [], []>} : vector<8x4xbf16>, vector<4x384xbf16>, vector<8x384xf32> -> vector<8x384xf32>
    %c0_197 = arith.constant 0 : index
    %c0_198 = arith.constant 0 : index
    %145 = vector.load %arg8[%c0_197, %c0_198] : memref<8x1xf32, #tpu.memory_space<vmem>>, vector<8x1xf32>
    %146 = vector.broadcast %145 : vector<8x1xf32> to vector<8x384xf32>
    %147 = arith.addf %144, %146 : vector<8x384xf32>
    %148 = arith.addf %140, %147 : vector<8x384xf32>
    %cst_199 = arith.constant 0.000000e+00 : f32
    %149 = vector.broadcast %cst_199 : f32 to vector<8x384xf32>
    %150 = arith.maximumf %148, %149 : vector<8x384xf32>
    %c1_200 = arith.constant 1 : index
    %c0_201 = arith.constant 0 : index
    %c0_202 = arith.constant 0 : index
    %151 = vector.load %arg9[%c1_200, %c0_201, %c0_202] : memref<2x8x384xf32, #tpu.memory_space<vmem>>, vector<1x8x384xf32>
    %152 = vector.shape_cast %151 : vector<1x8x384xf32> to vector<8x384xf32>
    %153 = vector.shape_cast %150 : vector<8x384xf32> to vector<1x8x384xf32>
    tpu.vector_store %arg9[%c1_200, %c0_201, %c0_202], %153 {strides = array<i32>} : memref<2x8x384xf32, #tpu.memory_space<vmem>>, vector<1x8x384xf32>,
    return
  }
  func.func @transform_0(%arg0: i32) -> (i32, i32, i32) {
    %c0_i32 = arith.constant 0 : i32
    %c0_i32_0 = arith.constant 0 : i32
    %c0_i32_1 = arith.constant 0 : i32
    return %arg0, %c0_i32, %c0_i32_0 : i32, i32, i32
  }
  func.func @transform_1(%arg0: i32) -> (i32, i32) {
    %c0_i32 = arith.constant 0 : i32
    %c0_i32_0 = arith.constant 0 : i32
    %c0_i32_1 = arith.constant 0 : i32
    return %c0_i32, %c0_i32_0 : i32, i32
  }
  func.func @transform_2(%arg0: i32) -> (i32, i32) {
    %c0_i32 = arith.constant 0 : i32
    %c0_i32_0 = arith.constant 0 : i32
    %c0_i32_1 = arith.constant 0 : i32
    return %c0_i32, %c0_i32_0 : i32, i32
  }
  func.func @transform_3(%arg0: i32) -> (i32, i32) {
    %c0_i32 = arith.constant 0 : i32
    %c0_i32_0 = arith.constant 0 : i32
    %c0_i32_1 = arith.constant 0 : i32
    return %c0_i32, %c0_i32_0 : i32, i32
  }
  func.func @transform_4(%arg0: i32) -> (i32, i32) {
    %c0_i32 = arith.constant 0 : i32
    %c0_i32_0 = arith.constant 0 : i32
    %c0_i32_1 = arith.constant 0 : i32
    return %c0_i32, %c0_i32_0 : i32, i32
  }
  func.func @transform_5(%arg0: i32) -> (i32, i32) {
    %c0_i32 = arith.constant 0 : i32
    %c0_i32_0 = arith.constant 0 : i32
    %c0_i32_1 = arith.constant 0 : i32
    return %c0_i32, %c0_i32_0 : i32, i32
  }
  func.func @transform_6(%arg0: i32) -> (i32, i32) {
    %c0_i32 = arith.constant 0 : i32
    %c0_i32_0 = arith.constant 0 : i32
    %c0_i32_1 = arith.constant 0 : i32
    return %c0_i32, %c0_i32_0 : i32, i32
  }
  func.func @transform_7(%arg0: i32) -> (i32, i32) {
    %c0_i32 = arith.constant 0 : i32
    %c0_i32_0 = arith.constant 0 : i32
    %c0_i32_1 = arith.constant 0 : i32
    return %c0_i32, %c0_i32_0 : i32, i32
  }
  func.func @transform_8(%arg0: i32) -> (i32, i32, i32) {
    %c0_i32 = arith.constant 0 : i32
    %c0_i32_0 = arith.constant 0 : i32
    %c0_i32_1 = arith.constant 0 : i32
    return %arg0, %c0_i32, %c0_i32_0 : i32, i32, i32
  }
}

</mosaic_0001>

<bundles_post_ra>
// kernel: residual_block_2d_forward.1
= control target key start
LH: loop header
LB: loop body
LE: loop exit
PB: predicated region body
PF: predicated region fallthrough
CT: control target
= control target key end

     0   :  { %v59_v0 = vlaneseq  ;;  %v2387_v2 = vmov 1983009808   ;;  %s2388_s9 = smov 90   ;;  %s2389_s10 = smov 109   ;;  %v2396_v23 = vmov 0   ;;  %vm87_vm0 = vcmask 1043456   ;;  %s2957_s0 = inlined_call_operand.vmem [shape: bf16[2,4,550], index: 0, kind: input, shape index: {}]   ;;  %s2958_s3 = inlined_call_operand.vmem [shape: f32[8,1], index: 3, kind: input, shape index: {}]   ;;  %s2959_s2 = inlined_call_operand.vmem [shape: bf16[8,36], index: 2, kind: input, shape index: {}]   ;;  %s2960_s1 = inlined_call_operand.vmem [shape: f32[1,512], index: 1, kind: input, shape index: {}]   ;;  %s2961_s4 = inlined_call_operand.vmem [shape: bf16[8,72], index: 4, kind: input, shape index: {}]   ;;  %s2962_s6 = inlined_call_operand.vmem [shape: bf16[8,4], index: 6, kind: input, shape index: {}]   ;;  %s2963_s5 = inlined_call_operand.vmem [shape: f32[8,1], index: 5, kind: input, shape index: {}]   ;;  %s2964_s7 = inlined_call_operand.vmem [shape: f32[8,1], index: 7, kind: input, shape index: {}]   ;;  %s2965_s8 = inlined_call_operand.vmem [shape: f32[2,8,384], index: 8, kind: output, shape index: {}]  }
   0x1   :  { %v2155_v1 = vld.sshfl [vmem:[%s2957_s0 + $0x8] sm:$0x3 pattern:$0x76325410]  ;;  %v57_v3 = vunpack.c.l.s4 %v2387_v2  ;;  %v364_v4 = vld [vmem:[%s2957_s0] sm:$0xff]  ;;  %s2390_s11 = smov 108   ;;  %524 = vmatprep.mubr.bf16.mxu0 %v2396_v23  ;;  %565 = vmatprep.mubr.bf16.mxu1 %v2396_v23 }
   0x2   :  { %394 = vrot.lane.b32.xlu1 %v2155_v1, %s2388_s9  ;;  %v2451_v5 = vshrl.u32 %v59_v0, 7  ;;  %v368_v6 = vcombine.high %v364_v4, %v364_v4  ;;  %2150 = vst.sshfl [vmem:[#allocation2] sm:$0xf pattern:$0x76325410] %v364_v4  ;;  %v234_v11 = vcombine.low %v364_v4, %v364_v4  ;;  %s2391_s14 = smov 92   ;;  %2333 = vset.pattern.permute.xlu0 %v2396_v23 }
   0x3   :  { %v58_v7 = vunpack.c.0.s8 %v57_v3  ;;  %v2337_v13 = vld [vmem:[%s2957_s0 + $0x8] ss:$0 sps:$4 sm:$0x33]   ;;  %s2392_s15 = smov 91   ;;  %s2393_s20 = smov 127   ;;  %v2517_v21 = vld [vmem:[%s2957_s0 + $0xa] sm:$0xff]  ;;  %2334 = vset.pattern.permute.xlu1 %v2396_v23 }
   0x4   :  { %2151 = vst.sshfl [vmem:[#allocation2 + $0x8] sm:$0xf pattern:$0x76325410] %v368_v6  ;;  %s2394_s21 = smov 126   ;;  %s2395_s24 = smov 110   ;;  %v2521_v22 = vcombine.high %v2517_v21, %v2517_v21  ;;  %v1294_v28 = vcombine.low %v2517_v21, %v2517_v21 }
   0x5   :  { %v2454_v8 = vsub.s32 %v58_v7, %v2451_v5  ;;  %v2339_v15 = vld [vmem:[%s2957_s0 + $0x8] ss:$0 sps:$4 sm:$0x33]   ;;  %v2534_v25 = vld [vmem:[%s2958_s3] sm:$0xff]  ;;  %vm400_vm1 = vcmask 736256   ;;  %vm222_vm2 = vcmask 891904  }
   0x6   :  { %216 = vrot.lane.b32.xlu1 %v2155_v1, %s2389_s10  ;;  %v2338_v16 = vld [vmem:[%s2957_s0 + $0x8] ss:$0 sps:$4 sm:$0x33]   ;;  %v2356_v30 = vld [vmem:[%s2957_s0 + $0x12] ss:$0 sps:$4 sm:$0x33]  }
   0x7   :  { %v2458_v9 = vrot.slane %v364_v4, %v2454_v8  ;;  %v2463_v10 = vrot.slane %v368_v6, %v2454_v8  ;;  %v241_v12 = vrot.slane %v234_v11, %v2454_v8  ;;  %v256_v14 = vrot.slane %v2337_v13, %v2454_v8  ;;  %v2340_v19 = vld [vmem:[%s2957_s0 + $0x8] ss:$0 sps:$4 sm:$0x33]   ;;  %v2357_v32 = vld [vmem:[%s2957_s0 + $0x12] ss:$0 sps:$4 sm:$0x33]  }
   0x8   :  { %v77_v17 = vrot.slane %v2339_v15, %v2454_v8  ;;  %v345_v18 = vrot.slane %v2338_v16, %v2454_v8  ;;  %v167_v20 = vrot.slane %v2340_v19, %v2454_v8  ;;  %v2529_v24 = vrot.slane %v2521_v22, %v2454_v8  ;;  %v2550_v27 = vld.sshfl [vmem:[%s2957_s0 + $0x12] sm:$0x3 pattern:$0x76325410] }
   0x9   :  { %390 = vrot.lane.b32.xlu0 %v2458_v9, %s2388_s9  ;;  %v2539_v26 = vrot.slane %v2517_v21, %v2454_v8  ;;  %v2561_v29 = vrot.slane %v1294_v28, %v2454_v8  ;;  %v1316_v31 = vrot.slane %v2356_v30, %v2454_v8  ;;  %v1403_v33 = vrot.slane %v2357_v32, %v2454_v8 }
   0xa   :  { %212 = vrot.lane.b32.xlu1 %v2458_v9, %s2389_s10  ;;  %vm267_vm3 = vcmask 883712   ;;  %vm479_vm4 = vcmask 1041408   ;;  %vm311_vm5 = vcmask 752640   ;;  %vm356_vm6 = vcmask 744448  }
   0xb   :  { %vm89_vm7 = vcmask 1039360   ;;  %vm133_vm8 = vcmask 1031168   ;;  %vm178_vm9 = vcmask 900096   ;;  %vm475_vm10 = vcmask 293888  }
   0xc   :  { %vm2398_vm11 = vmmov 0   ;;  %vm859_vm12 = vcmask 588800   ;;  %vm991_vm13 = vcmask 31744  }
   0xd   :  { %392 = vrot.lane.b32.xlu0 %v2463_v10, %s2388_s9 }
   0xe   :  { %259 = vrot.lane.b32.xlu1 %v2458_v9, %s2390_s11 }
  0x11   :  { %214 = vrot.lane.b32.xlu0 %v2463_v10, %s2389_s10 }
  0x12   :  { %301 = vrot.lane.b32.xlu1 %v2458_v9, %s2391_s14 }
  0x15   :  { %257 = vrot.lane.b32.xlu0 %v241_v12, %s2390_s11 }
  0x16   :  { %305 = vrot.lane.b32.xlu1 %v2155_v1, %s2391_s14 }
  0x19   :  { %261 = vrot.lane.b32.xlu0 %v256_v14, %s2390_s11 }
  0x1a   :  { %348 = vrot.lane.b32.xlu1 %v2458_v9, %s2392_s15 }
  0x1d   :  { %303 = vrot.lane.b32.xlu0 %v2463_v10, %s2391_s14 }
  0x1e   :  { %78 = vrot.lane.b32.xlu1 %v241_v12, %s2393_s20 }
  0x21   :  { %346 = vrot.lane.b32.xlu0 %v241_v12, %s2392_s15 }
  0x22   :  { %82 = vrot.lane.b32.xlu1 %v77_v17, %s2393_s20 }
  0x25   :  { %350 = vrot.lane.b32.xlu0 %v345_v18, %s2392_s15 }
  0x26   :  { %125 = vrot.lane.b32.xlu1 %v2463_v10, %s2394_s21 }
  0x29   :  { %80 = vrot.lane.b32.xlu0 %v2458_v9, %s2393_s20 }
  0x2a   :  { %168 = vrot.lane.b32.xlu1 %v241_v12, %s2395_s24 }
  0x2d   :  { %123 = vrot.lane.b32.xlu0 %v2458_v9, %s2394_s21 }
  0x2e   :  { %172 = vrot.lane.b32.xlu1 %v167_v20, %s2395_s24 }
  0x31   :  { %127 = vrot.lane.b32.xlu0 %v2155_v1, %s2394_s21 }
  0x32   :  { %1449 = vrot.lane.b32.xlu1 %v2529_v24, %s2388_s9 }
  0x35   :  { %170 = vrot.lane.b32.xlu0 %v2458_v9, %s2395_s24 }
  0x36   :  { %1273 = vrot.lane.b32.xlu1 %v2539_v26, %s2389_s10 }
  0x39   :  { %422 = vperm.xlu0 %2333, %v2534_v25  }
  0x3a   :  { %1277 = vrot.lane.b32.xlu1 %v2550_v27, %s2389_s10 }
  0x3d   :  { %1447 = vrot.lane.b32.xlu0 %v2539_v26, %s2388_s9 }
  0x3e   :  { %1319 = vrot.lane.b32.xlu1 %v2539_v26, %s2390_s11 }
  0x41   :  { %1451 = vrot.lane.b32.xlu0 %v2550_v27, %s2388_s9 }
  0x42   :  { %1360 = vrot.lane.b32.xlu1 %v2539_v26, %s2391_s14 }
  0x45   :  { %1275 = vrot.lane.b32.xlu0 %v2529_v24, %s2389_s10 }
  0x46   :  { %1364 = vrot.lane.b32.xlu1 %v2550_v27, %s2391_s14 }
  0x49   :  { %1317 = vrot.lane.b32.xlu0 %v2561_v29, %s2390_s11 }
  0x4a   :  { %1406 = vrot.lane.b32.xlu1 %v2539_v26, %s2392_s15 }
  0x4d   :  { %1321 = vrot.lane.b32.xlu0 %v1316_v31, %s2390_s11 }
  0x4e   :  { %1143 = vrot.lane.b32.xlu1 %v2561_v29, %s2393_s20 }
  0x51   :  { %1362 = vrot.lane.b32.xlu0 %v2529_v24, %s2391_s14 }
  0x55   :  { %1404 = vrot.lane.b32.xlu0 %v2561_v29, %s2392_s15 }
  0x59   :  { %1408 = vrot.lane.b32.xlu0 %v1403_v33, %s2392_s15 }
  0x5d   :  { %1145 = vrot.lane.b32.xlu0 %v2539_v26, %s2393_s20 }
  0x74   :  { %v395_v34 = vpop.permute.xlu1 %394 }
  0x75   :  { %v398_v38 = vrot.slane %v395_v34, 4 }
  0x78   :  { %v217_v35 = vpop.permute.xlu1 %216 }
  0x79   :  { %v220_v45 = vrot.slane %v217_v35, 4 }
  0x7b   :  { %v391_v36 = vpop.permute.xlu0 %390 }
  0x7c   :  { %v213_v37 = vpop.permute.xlu1 %212  ;;  %v396_v40 = vrot.slane %v391_v36, 4 }
  0x7d   :  { %v218_v46 = vrot.slane %v213_v37, 4 }
  0x7f   :  { %v393_v39 = vpop.permute.xlu0 %392 }
  0x80   :  { %v397_v41 = vrot.slane %v393_v39, 4  ;;  %v260_v42 = vpop.permute.xlu1 %259 }
  0x81   :  { %v264_v54 = vrot.slane %v260_v42, 4 }
  0x82   :  { %v399_v43 = vsel %vm87_vm0, %v396_v40, %v397_v41  ;;  %v402_v44 = vsel %vm87_vm0, %v397_v41, %v398_v38 }
  0x83   :  { %v401_v47 = vsel %vm400_vm1, %v391_v36, %v399_v43  ;;  %v403_v48 = vsel %vm400_vm1, %v393_v39, %v402_v44  ;;  %v215_v49 = vpop.permute.xlu0 %214 }
  0x84   :  { %406 = vst [vmem:[#allocation2 + $0x40] sm:$0x33] %v401_v47  ;;  %407 = vst [vmem:[#allocation2 + $0x48] sm:$0x33] %v403_v48  ;;  %v219_v50 = vrot.slane %v215_v49, 4  ;;  %v302_v51 = vpop.permute.xlu1 %301 }
  0x85   :  { %v307_v11 = vrot.slane %v302_v51, 4 }
  0x86   :  { %v221_v52 = vsel %vm87_vm0, %v218_v46, %v219_v50  ;;  %v224_v53 = vsel %vm87_vm0, %v219_v50, %v220_v45 }
  0x87   :  { %v223_v55 = vsel %vm222_vm2, %v213_v37, %v221_v52  ;;  %v225_v56 = vsel %vm222_vm2, %v215_v49, %v224_v53  ;;  %v258_v57 = vpop.permute.xlu0 %257 }
  0x88   :  { %228 = vst [vmem:[#allocation2 + $0x20] sm:$0x33] %v223_v55  ;;  %229 = vst [vmem:[#allocation2 + $0x28] sm:$0x33] %v225_v56  ;;  %v263_v58 = vrot.slane %v258_v57, 4  ;;  %v306_v59 = vpop.permute.xlu1 %305 }
  0x89   :  { %v309_v14 = vrot.slane %v306_v59, 4 }
  0x8a   :  { %v266_v60 = vsel %vm87_vm0, %v263_v58, %v264_v54 }
  0x8b   :  { %v268_v61 = vsel %vm267_vm3, %v258_v57, %v266_v60  ;;  %v262_v62 = vpop.permute.xlu0 %261  ;;  %v417_v63 = vld [vmem:[#allocation2 + $0x40] sm:$0x33]  ;;  %v418_v0 = vld [vmem:[#allocation2 + $0x48] sm:$0x33] }
  0x8c   :  { %273 = vst [vmem:[#allocation2 + $0x20] sm:$0xcc] %v268_v61  ;;  %v265_v1 = vrot.slane %v262_v62, 4  ;;  %v2165_v2 = vcombine.high %v417_v63, %v417_v63  ;;  %v2167_v3 = vcombine.high %v418_v0, %v418_v0  ;;  %v2164_v4 = vcombine.low %v417_v63, %v417_v63  ;;  %v349_v6 = vpop.permute.xlu1 %348 }
  0x8d   :  { %v2166_v7 = vcombine.low %v418_v0, %v418_v0  ;;  %v353_v30 = vrot.slane %v349_v6, 4 }
  0x8e   :  { %v269_v12 = vsel %vm87_vm0, %v264_v54, %v265_v1  ;;  %2168 = vmatprep.subr.msk.bf16.mxu0 %vm479_vm4, %v2165_v2  ;;  %2170 = vmatprep.subr.msk.bf16.mxu1 %vm479_vm4, %v2167_v3  ;;  %v481_v13 = vsel %vm479_vm4, %v2164_v4, 0 }
  0x8f   :  { %v270_v15 = vsel %vm267_vm3, %v260_v42, %v269_v12  ;;  %503 = vmatpush1.bf16.msra.mxu0 %v481_v13  ;;  %v487_v16 = vsel %vm479_vm4, %v2166_v7, 0  ;;  %v304_v17 = vpop.permute.xlu0 %303 }
  0x90   :  { %274 = vst [vmem:[#allocation2 + $0x28] sm:$0xcc] %v270_v15  ;;  %544 = vmatpush1.bf16.msra.mxu1 %v487_v16  ;;  %v308_v18 = vrot.slane %v304_v17, 4  ;;  %v79_v19 = vpop.permute.xlu1 %78 }
  0x91   :  { %v84_v42 = vrot.slane %v79_v19, 4 }
  0x92   :  { %v310_v20 = vsel %vm87_vm0, %v307_v11, %v308_v18  ;;  %v313_v28 = vsel %vm87_vm0, %v308_v18, %v309_v14 }
  0x93   :  { %v312_v31 = vsel %vm311_vm5, %v302_v51, %v310_v20  ;;  %v314_v32 = vsel %vm311_vm5, %v304_v17, %v313_v28  ;;  %v347_v33 = vpop.permute.xlu0 %346 }
  0x94   :  { %317 = vst [vmem:[#allocation2 + $0x30] sm:$0x33] %v312_v31  ;;  %318 = vst [vmem:[#allocation2 + $0x38] sm:$0x33] %v314_v32  ;;  %v352_v34 = vrot.slane %v347_v33, 4  ;;  %v83_v35 = vpop.permute.xlu1 %82 }
  0x95   :  { %v86_v43 = vrot.slane %v83_v35, 4 }
  0x96   :  { %v355_v36 = vsel %vm87_vm0, %v352_v34, %v353_v30 }
  0x97   :  { %v357_v37 = vsel %vm356_vm6, %v347_v33, %v355_v36  ;;  %v351_v38 = vpop.permute.xlu0 %350 }
  0x98   :  { %362 = vst [vmem:[#allocation2 + $0x30] sm:$0xcc] %v357_v37  ;;  %v354_v39 = vrot.slane %v351_v38, 4  ;;  %v126_v40 = vpop.permute.xlu1 %125 }
  0x99   :  { %v130_v50 = vrot.slane %v126_v40, 4 }
  0x9a   :  { %v358_v41 = vsel %vm87_vm0, %v353_v30, %v354_v39  ;;  %v408_v30 = vld [vmem:[%s2959_s2] sm:$0xf] }
  0x9b   :  { %v359_v44 = vsel %vm356_vm6, %v349_v6, %v358_v41  ;;  %v81_v45 = vpop.permute.xlu0 %80 }
  0x9c   :  { %363 = vst [vmem:[#allocation2 + $0x38] sm:$0xcc] %v359_v44  ;;  %v85_v46 = vrot.slane %v81_v45, 4  ;;  %v169_v47 = vpop.permute.xlu1 %168 }
  0x9d   :  { %v174_v1 = vrot.slane %v169_v47, 4 }
  0x9e   :  { %v88_v48 = vsel %vm87_vm0, %v84_v42, %v85_v46  ;;  %v91_v49 = vsel %vm87_vm0, %v85_v46, %v86_v43 }
  0x9f   :  { %v90_v51 = vsel %vm89_vm7, %v79_v19, %v88_v48  ;;  %v92_v52 = vsel %vm89_vm7, %v81_v45, %v91_v49  ;;  %v124_v53 = vpop.permute.xlu0 %123  ;;  %v2345_v54 = vld [vmem:[#allocation2 + $0x24] ss:$16 sps:$4 sm:$0xff]   ;;  %v2347_v55 = vld [vmem:[#allocation2 + $0x20] ss:$16 sps:$4 sm:$0xff]  }
  0xa0   :  { %95 = vst [vmem:[#allocation2] sm:$0xcc] %v90_v51  ;;  %96 = vst [vmem:[#allocation2 + $0x8] sm:$0xcc] %v92_v52  ;;  %v129_v56 = vrot.slane %v124_v53, 4  ;;  %504 = vmatprep.subr.bf16.mxu0 %v2345_v54  ;;  %v173_v62 = vpop.permute.xlu1 %172 }
  0xa1   :  { %505 = vmatpush1.bf16.msra.mxu0 %v2347_v55  ;;  %v176_v2 = vrot.slane %v173_v62, 4 }
  0xa2   :  { %v132_v57 = vsel %vm87_vm0, %v129_v56, %v130_v50 }
  0xa3   :  { %v134_v58 = vsel %vm133_vm8, %v124_v53, %v132_v57  ;;  %v128_v59 = vpop.permute.xlu0 %127  ;;  %v2348_v60 = vld [vmem:[#allocation2 + $0x2c] ss:$16 sps:$4 sm:$0xff]   ;;  %v2350_v61 = vld [vmem:[#allocation2 + $0x28] ss:$16 sps:$4 sm:$0xff]  }
  0xa4   :  { %139 = vst [vmem:[#allocation2 + $0x10] sm:$0x33] %v134_v58  ;;  %v131_v63 = vrot.slane %v128_v59, 4  ;;  %545 = vmatprep.subr.bf16.mxu1 %v2348_v60  ;;  %v1450_v33 = vpop.permute.xlu1 %1449 }
  0xa5   :  { %546 = vmatpush1.bf16.msra.mxu1 %v2350_v61  ;;  %v1454_v35 = vrot.slane %v1450_v33, 4 }
  0xa6   :  { %v135_v0 = vsel %vm87_vm0, %v130_v50, %v131_v63 }
  0xa7   :  { %v136_v3 = vsel %vm133_vm8, %v126_v40, %v135_v0  ;;  %v171_v4 = vpop.permute.xlu0 %170  ;;  %v409_v14 = vld [vmem:[#allocation2] sm:$0xff]  ;;  %v410_v15 = vld [vmem:[#allocation2 + $0x8] sm:$0xff] }
  0xa8   :  { %140 = vst [vmem:[#allocation2 + $0x18] sm:$0x33] %v136_v3  ;;  %v175_v6 = vrot.slane %v171_v4, 4  ;;  %v1274_v39 = vpop.permute.xlu1 %1273 }
  0xa9   :  { %v1279_v42 = vrot.slane %v1274_v39, 4 }
  0xaa   :  { %v177_v7 = vsel %vm87_vm0, %v174_v1, %v175_v6  ;;  %v180_v11 = vsel %vm87_vm0, %v175_v6, %v176_v2 }
  0xab   :  { %v179_v12 = vsel %vm178_vm9, %v169_v47, %v177_v7  ;;  %v181_v13 = vsel %vm178_vm9, %v171_v4, %v180_v11 }
  0xac   :  { %184 = vst [vmem:[#allocation2 + $0x10] sm:$0xcc] %v179_v12  ;;  %185 = vst [vmem:[#allocation2 + $0x18] sm:$0xcc] %v181_v13  ;;  %v1278_v45 = vpop.permute.xlu1 %1277 }
  0xad   :  { %v1281_v47 = vrot.slane %v1278_v45, 4 }
  0xb0   :  { %v1320_v53 = vpop.permute.xlu1 %1319 }
  0xb1   :  { %v1324_v55 = vrot.slane %v1320_v53, 4 }
  0xb3   :  { %v411_v16 = vld [vmem:[#allocation2 + $0x10] sm:$0xff]  ;;  %v412_v18 = vld [vmem:[#allocation2 + $0x18] sm:$0xff] }
  0xb4   :  { %v2351_v17 = vld [vmem:[#allocation2 + $0x4] ss:$16 sps:$4 sm:$0xff]   ;;  %v2354_v19 = vld [vmem:[#allocation2 + $0xc] ss:$16 sps:$4 sm:$0xff]   ;;  %v2156_v20 = vcombine.low %v409_v14, %v411_v16  ;;  %v2158_v28 = vcombine.low %v410_v15, %v412_v18  ;;  %v2640_v31 = vpop.permute.xlu0 %422  ;;  %v1361_v59 = vpop.permute.xlu1 %1360 }
  0xb5   :  { %2196 = vst.sshfl [vmem:[#allocation2] sm:$0xf pattern:$0x76325410] %v2517_v21  ;;  %506 = vmatprep.subr.bf16.mxu0 %v2351_v17  ;;  %547 = vmatprep.subr.bf16.mxu1 %v2354_v19  ;;  %v1366_v62 = vrot.slane %v1361_v59, 4 }
  0xb6   :  { %2197 = vst.sshfl [vmem:[#allocation2 + $0x8] sm:$0xf pattern:$0x76325410] %v2521_v22  ;;  %507 = vmatpush1.bf16.msra.mxu0 %v2156_v20  ;;  %548 = vmatpush1.bf16.msra.mxu1 %v2158_v28 }
  0xb7   :  { %v2358_v21 = vld [vmem:[%s2957_s0 + $0x12] ss:$0 sps:$4 sm:$0x33]  }
  0xb8   :  { %v1142_v22 = vrot.slane %v2358_v21, %v2454_v8  ;;  %v1448_v32 = vpop.permute.xlu0 %1447  ;;  %v1365_v1 = vpop.permute.xlu1 %1364 }
  0xb9   :  { %2169 = vmatmul.mubr.msk.bf16.vlgmr.msra.gmra.mxu0 %vm475_vm10, %v408_v30  ;;  %2171 = vmatmul.mubr.msk.bf16.vlgmr.msra.gmra.mxu1 %vm475_vm10, %v408_v30  ;;  %v1453_v34 = vrot.slane %v1448_v32, 4  ;;  %v1368_v3 = vrot.slane %v1365_v1, 4 }
  0xba   :  { %905 = vmatprep.mubr.bf16.mxu0 %v2396_v23  ;;  %1147 = vrot.lane.b32.xlu1 %v1142_v22, %s2393_s20 }
  0xbb   :  { %v1456_v36 = vsel %vm87_vm0, %v1453_v34, %v1454_v35 }
  0xbc   :  { %v1457_v37 = vsel %vm400_vm1, %v1448_v32, %v1456_v36  ;;  %v1452_v38 = vpop.permute.xlu0 %1451  ;;  %v1407_v13 = vpop.permute.xlu1 %1406 }
  0xbd   :  { %1462 = vst [vmem:[#allocation2 + $0x40] sm:$0x33] %v1457_v37  ;;  %v1455_v40 = vrot.slane %v1452_v38, 4  ;;  %v1411_v15 = vrot.slane %v1407_v13, 4  ;;  %v590_v38 = vsub.s32 2, %v2451_v5 }
  0xbf   :  { %v1458_v41 = vsel %vm87_vm0, %v1454_v35, %v1455_v40  ;;  %v582_v40 = vsub.s32 0, %v2451_v5 }
  0xc0   :  { %v1459_v43 = vsel %vm400_vm1, %v1450_v33, %v1458_v41  ;;  %v1276_v44 = vpop.permute.xlu0 %1275  ;;  %v1144_v19 = vpop.permute.xlu1 %1143  ;;  %v586_v41 = vsub.s32 1, %v2451_v5 }
  0xc1   :  { %1463 = vst [vmem:[#allocation2 + $0x48] sm:$0x33] %v1459_v43  ;;  %v1280_v46 = vrot.slane %v1276_v44, 4  ;;  %v1149_v30 = vrot.slane %v1144_v19, 4  ;;  %v578_v43 = vld [vmem:[%s2960_s1] sm:$0xf] }
  0xc3   :  { %v1282_v48 = vsel %vm87_vm0, %v1279_v42, %v1280_v46  ;;  %v1284_v49 = vsel %vm87_vm0, %v1280_v46, %v1281_v47 }
  0xc4   :  { %v1283_v50 = vsel %vm222_vm2, %v1274_v39, %v1282_v48  ;;  %v1285_v51 = vsel %vm222_vm2, %v1276_v44, %v1284_v49  ;;  %v1318_v52 = vpop.permute.xlu0 %1317  ;;  %v594_v44 = vsub.s32 3, %v2451_v5  ;;  %v591_v48 = vrot.slane %v578_v43, %v590_v38 }
  0xc5   :  { %1288 = vst [vmem:[#allocation2 + $0x20] sm:$0x33] %v1283_v50  ;;  %1289 = vst [vmem:[#allocation2 + $0x28] sm:$0x33] %v1285_v51  ;;  %v1323_v54 = vrot.slane %v1318_v52, 4  ;;  %v583_v51 = vrot.slane %v578_v43, %v582_v40 }
  0xc7   :  { %v1326_v56 = vsel %vm87_vm0, %v1323_v54, %v1324_v55 }
  0xc8   :  { %v1327_v57 = vsel %vm267_vm3, %v1318_v52, %v1326_v56  ;;  %v1322_v58 = vpop.permute.xlu0 %1321 }
  0xc9   :  { %1332 = vst [vmem:[#allocation2 + $0x20] sm:$0xcc] %v1327_v57  ;;  %v1325_v60 = vrot.slane %v1322_v58, 4  ;;  %v595_v57 = vrot.slane %v578_v43, %v594_v44 }
  0xcb   :  { %v1328_v61 = vsel %vm87_vm0, %v1324_v55, %v1325_v60 }
  0xcc   :  { %v1329_v63 = vsel %vm267_vm3, %v1320_v53, %v1328_v61  ;;  %v1363_v0 = vpop.permute.xlu0 %1362  ;;  %v587_v53 = vrot.slane %v578_v43, %v586_v41 }
  0xcd   :  { %1333 = vst [vmem:[#allocation2 + $0x28] sm:$0xcc] %v1329_v63  ;;  %v1367_v2 = vrot.slane %v1363_v0, 4 }
  0xcf   :  { %v1369_v4 = vsel %vm87_vm0, %v1366_v62, %v1367_v2  ;;  %v1371_v6 = vsel %vm87_vm0, %v1367_v2, %v1368_v3 }
  0xd0   :  { %v1370_v7 = vsel %vm311_vm5, %v1361_v59, %v1369_v4  ;;  %v1372_v11 = vsel %vm311_vm5, %v1363_v0, %v1371_v6  ;;  %v1405_v12 = vpop.permute.xlu0 %1404 }
  0xd1   :  { %1375 = vst [vmem:[#allocation2 + $0x30] sm:$0x33] %v1370_v7  ;;  %1376 = vst [vmem:[#allocation2 + $0x38] sm:$0x33] %v1372_v11  ;;  %v1410_v14 = vrot.slane %v1405_v12, 4 }
  0xd2   :  { %v2359_v11 = vld [vmem:[%s2957_s0 + $0x12] ss:$0 sps:$4 sm:$0x33]  }
  0xd3   :  { %v1413_v16 = vsel %vm87_vm0, %v1410_v14, %v1411_v15 }
  0xd4   :  { %v1414_v17 = vsel %vm356_vm6, %v1405_v12, %v1413_v16  ;;  %v1409_v18 = vpop.permute.xlu0 %1408 }
  0xd5   :  { %1419 = vst [vmem:[#allocation2 + $0x30] sm:$0xcc] %v1414_v17  ;;  %v1412_v20 = vrot.slane %v1409_v18, 4 }
  0xd7   :  { %v1415_v28 = vsel %vm87_vm0, %v1411_v15, %v1412_v20 }
  0xd8   :  { %v1416_v21 = vsel %vm356_vm6, %v1407_v13, %v1415_v28  ;;  %v1146_v22 = vpop.permute.xlu0 %1145 }
  0xd9   :  { %1420 = vst [vmem:[#allocation2 + $0x38] sm:$0xcc] %v1416_v21  ;;  %v1150_v32 = vrot.slane %v1146_v22, 4 }
  0xdb   :  { %v1152_v33 = vsel %vm87_vm0, %v1149_v30, %v1150_v32 }
  0xdc   :  { %v1153_v34 = vsel %vm89_vm7, %v1144_v19, %v1152_v33 }
  0xdd   :  { %1158 = vst [vmem:[#allocation2] sm:$0xcc] %v1153_v34 }
 0x12c   :  { %v1148_v35 = vpop.permute.xlu1 %1147 }
 0x12d   :  { %v1151_v36 = vrot.slane %v1148_v35, 4 }
 0x12f   :  { %v1154_v37 = vsel %vm87_vm0, %v1150_v32, %v1151_v36 }
 0x130   :  { %v1155_v39 = vsel %vm89_vm7, %v1146_v22, %v1154_v37 }
 0x131   :  { %1159 = vst [vmem:[#allocation2 + $0x8] sm:$0xcc] %v1155_v39 }
 0x179   :  { %v526_v42 = vpop.f32.mrf.mxu0  ;;  %v567_v46 = vpop.f32.mrf.mxu1 }
 0x17a   :  { %v527_v45 = vadd.f32 %v526_v42, %v2640_v31  ;;  %v568_v47 = vadd.f32 %v567_v46, %v2640_v31 }
 0x17b   :  { %v528_v49 = vpop.f32.mrf.mxu0  ;;  %v569_v54 = vpop.f32.mrf.mxu1 }
 0x17c   :  { %v574_v50 = vmax.f32 %v527_v45, 0.0  ;;  %v529_v52 = vadd.f32 %v528_v49, %v2640_v31  ;;  %v576_v55 = vmax.f32 %v568_v47, 0.0  ;;  %v570_v56 = vadd.f32 %v569_v54, %v2640_v31 }
 0x17d   :  { %v530_v58 = vpop.f32.mrf.mxu0  ;;  %v571_v60 = vpop.f32.mrf.mxu1  ;;  %v2397_v31 = vmov 0.0  }
 0x17e   :  { %v575_v59 = vmax.f32 %v529_v52, 0.0  ;;  %v602_v61 = vmul.f32 %v591_v48, %v576_v55  ;;  %v577_v62 = vmax.f32 %v570_v56, 0.0  ;;  %v600_v0 = vmul.f32 %v583_v51, %v574_v50  ;;  %2281 = vmatprep.subr.bf16.mxu1 %v2397_v31  ;;  %2291 = vmatprep.mubr.msk.bf16.mxu1 %vm2398_vm11, %v2397_v31 }
 0x17f   :  { %v531_v63 = vpop.f32.mrf.mxu0  ;;  %v572_v2 = vpop.f32.mrf.mxu1 }
 0x180   :  { %v601_v1 = vmul.f32 %v587_v53, %v575_v59  ;;  %v603_v3 = vmul.f32 %v595_v57, %v577_v62 }
 0x182   :  { %v2685_v4 = vpack.c.bf16 %v601_v1, %v600_v0  ;;  %v2262_v6 = vpack.c.bf16 %v603_v3, %v602_v61 }
 0x184   :  { %749 = vrot.lane.b32.xlu1 %v2685_v4, %s2388_s9  ;;  %715 = vrot.lane.b32.xlu0 %v2685_v4, %s2391_s14  ;;  %621 = vst [vmem:[#allocation3 + $0x8] sm:$0xff] %v2262_v6 }
 0x188   :  { %732 = vrot.lane.b32.xlu0 %v2685_v4, %s2392_s15  ;;  %751 = vrot.lane.b32.xlu1 %v2262_v6, %s2388_s9 }
 0x18b   :  { %v623_v7 = vld [vmem:[#allocation3 + $0x8] sm:$0xf] }
 0x18c   :  { %681 = vrot.lane.b32.xlu0 %v2685_v4, %s2389_s10  ;;  %717 = vrot.lane.b32.xlu1 %v2262_v6, %s2391_s14  ;;  %625 = vst [vmem:[#allocation4 + $0x8] sm:$0xf] %v623_v7 }
 0x190   :  { %698 = vrot.lane.b32.xlu0 %v2685_v4, %s2390_s11  ;;  %734 = vrot.lane.b32.xlu1 %v2262_v6, %s2392_s15 }
 0x194   :  { %647 = vrot.lane.b32.xlu0 %v2685_v4, %s2394_s21  ;;  %683 = vrot.lane.b32.xlu1 %v2262_v6, %s2389_s10 }
 0x198   :  { %664 = vrot.lane.b32.xlu0 %v2685_v4, %s2395_s24  ;;  %700 = vrot.lane.b32.xlu1 %v2262_v6, %s2390_s11 }
 0x19c   :  { %630 = vrot.lane.b32.xlu0 %v2685_v4, %s2393_s20  ;;  %649 = vrot.lane.b32.xlu1 %v2262_v6, %s2394_s21 }
 0x1a0   :  { %1186 = vrot.lane.b32.xlu0 %v2539_v26, %s2394_s21  ;;  %666 = vrot.lane.b32.xlu1 %v2262_v6, %s2395_s24 }
 0x1a4   :  { %1190 = vrot.lane.b32.xlu0 %v2550_v27, %s2394_s21  ;;  %632 = vrot.lane.b32.xlu1 %v2262_v6, %s2393_s20  ;;  %v1229_v27 = vrot.slane %v2359_v11, %v2454_v8 }
 0x1a8   :  { %1232 = vrot.lane.b32.xlu0 %v2539_v26, %s2395_s24  ;;  %1188 = vrot.lane.b32.xlu1 %v2529_v24, %s2394_s21  ;;  %v978_v24 = vcombine.high %v2458_v9, %v2458_v9  ;;  %v979_v26 = vcombine.high %v2463_v10, %v2463_v10 }
 0x1ac   :  { %980 = vrot.lane.b32.xlu0 %v2458_v9, %s2388_s9  ;;  %1230 = vrot.lane.b32.xlu1 %v2561_v29, %s2395_s24 }
 0x1b0   :  { %984 = vrot.lane.b32.xlu0 %v2463_v10, %s2388_s9  ;;  %1234 = vrot.lane.b32.xlu1 %v1229_v27, %s2395_s24 }
 0x1b4   :  { %1478 = vperm.xlu0 %2333, %v2534_v25   ;;  %982 = vrot.lane.b32.xlu1 %v978_v24, %s2388_s9 }
 0x1b8   :  { %986 = vrot.lane.b32.xlu1 %v979_v26, %s2388_s9 }
 0x1f6   :  { %v750_v29 = vpop.permute.xlu1 %749  ;;  %v716_v12 = vpop.permute.xlu0 %715 }
 0x1f7   :  { %v753_v15 = vrot.slane %v750_v29, 4  ;;  %v719_v30 = vrot.slane %v716_v12, 4 }
 0x1fa   :  { %v733_v13 = vpop.permute.xlu0 %732  ;;  %v752_v14 = vpop.permute.xlu1 %751 }
 0x1fb   :  { %v754_v16 = vrot.slane %v752_v14, 4  ;;  %v736_v34 = vrot.slane %v733_v13, 4 }
 0x1fd   :  { %v755_v17 = vsel %vm87_vm0, %v753_v15, %v754_v16  ;;  %v757_v18 = vsel %vm400_vm1, %v752_v14, %v754_v16 }
 0x1fe   :  { %v756_v9 = vsel %vm400_vm1, %v750_v29, %v755_v17  ;;  %761 = vst [vmem:[#allocation4 + $0x68] sm:$0xf] %v757_v18  ;;  %v682_v25 = vpop.permute.xlu0 %681  ;;  %v718_v19 = vpop.permute.xlu1 %717 }
 0x1ff   :  { %v720_v20 = vrot.slane %v718_v19, 4  ;;  %v2187_v28 = vcombine.high %v756_v9, %v756_v9  ;;  %v2186_v10 = vcombine.low %v756_v9, %v756_v9  ;;  %v685_v52 = vrot.slane %v682_v25, 4 }
 0x201   :  { %v723_v21 = vsel %vm311_vm5, %v718_v19, %v720_v20  ;;  %2189 = vmatprep.subr.msk.bf16.mxu0 %vm87_vm0, %v2187_v28  ;;  %v865_v22 = vsel %vm87_vm0, %v2186_v10, 0  ;;  %v721_v35 = vsel %vm87_vm0, %v719_v30, %v720_v20 }
 0x202   :  { %727 = vst [vmem:[#allocation4 + $0x50] sm:$0xf] %v723_v21  ;;  %v699_v32 = vpop.permute.xlu0 %698  ;;  %v735_v33 = vpop.permute.xlu1 %734  ;;  %880 = vmatpush1.bf16.msra.mxu0 %v865_v22  ;;  %v722_v43 = vsel %vm311_vm5, %v716_v12, %v721_v35 }
 0x203   :  { %v737_v36 = vrot.slane %v735_v33, 4  ;;  %v702_v56 = vrot.slane %v699_v32, 4 }
 0x205   :  { %v738_v37 = vsel %vm87_vm0, %v736_v34, %v737_v36  ;;  %v740_v39 = vsel %vm356_vm6, %v735_v33, %v737_v36  ;;  %v2360_v42 = vld [vmem:[#allocation4 + $0x68] ss:$0 sps:$4 sm:$0xff]  }
 0x206   :  { %v739_v45 = vsel %vm356_vm6, %v733_v13, %v738_v37  ;;  %744 = vst [vmem:[#allocation4 + $0x5c] sm:$0xf] %v740_v39  ;;  %v648_v46 = vpop.permute.xlu0 %647  ;;  %v684_v47 = vpop.permute.xlu1 %683  ;;  %v871_v49 = vsel %vm87_vm0, %v2360_v42, 0 }
 0x207   :  { %v686_v48 = vrot.slane %v684_v47, 4  ;;  %v2184_v50 = vcombine.high %v722_v43, %v739_v45  ;;  %2282 = vmatpush3.bf16.msra.mxu1 %v871_v49  ;;  %v2183_v51 = vcombine.low %v722_v43, %v739_v45  ;;  %v651_v7 = vrot.slane %v648_v46, 4 }
 0x208   :  { %2283 = vmatprep.subr.bf16.mxu1 %v2397_v31 }
 0x209   :  { %v689_v53 = vsel %vm222_vm2, %v684_v47, %v686_v48  ;;  %881 = vmatprep.subr.bf16.mxu0 %v2184_v50  ;;  %v687_v57 = vsel %vm87_vm0, %v685_v52, %v686_v48  ;;  %v762_v50 = vld [vmem:[%s2961_s4] sm:$0xf] }
 0x20a   :  { %693 = vst [vmem:[#allocation4 + $0x38] sm:$0xf] %v689_v53  ;;  %v665_v54 = vpop.permute.xlu0 %664  ;;  %v701_v55 = vpop.permute.xlu1 %700  ;;  %882 = vmatpush1.bf16.msra.mxu0 %v2183_v51  ;;  %v688_v62 = vsel %vm222_vm2, %v682_v25, %v687_v57 }
 0x20b   :  { %v703_v58 = vrot.slane %v701_v55, 4  ;;  %v668_v26 = vrot.slane %v665_v54, 4 }
 0x20d   :  { %v704_v59 = vsel %vm87_vm0, %v702_v56, %v703_v58  ;;  %v706_v60 = vsel %vm267_vm3, %v701_v55, %v703_v58  ;;  %v2361_v61 = vld [vmem:[#allocation4 + $0x50] ss:$12 sps:$4 sm:$0xff]   ;;  %v1473_v58 = vld [vmem:[#allocation2 + $0x40] sm:$0x33] }
 0x20e   :  { %v705_v63 = vsel %vm267_vm3, %v699_v32, %v704_v59  ;;  %710 = vst [vmem:[#allocation4 + $0x44] sm:$0xf] %v706_v60  ;;  %v631_v0 = vpop.permute.xlu0 %630  ;;  %v650_v1 = vpop.permute.xlu1 %649  ;;  %2284 = vmatpush3.bf16.msra.mxu1 %v2361_v61 }
 0x20f   :  { %v652_v2 = vrot.slane %v650_v1, 4  ;;  %v2181_v3 = vcombine.high %v688_v62, %v705_v63  ;;  %v2180_v6 = vcombine.low %v688_v62, %v705_v63  ;;  %2285 = vmatprep.subr.bf16.mxu1 %v2397_v31  ;;  %v634_v25 = vrot.slane %v631_v0, 4 }
 0x211   :  { %v655_v11 = vsel %vm133_vm8, %v650_v1, %v652_v2  ;;  %883 = vmatprep.subr.bf16.mxu0 %v2181_v3  ;;  %v653_v29 = vsel %vm87_vm0, %v651_v7, %v652_v2  ;;  %v2226_v1 = vcombine.low %v1473_v58, %v1473_v58  ;;  %v1474_v2 = vld [vmem:[#allocation2 + $0x48] sm:$0x33]  ;;  %v955_v3 = vld [vmem:[%s2962_s6] sm:$0xf] }
 0x212   :  { %659 = vst [vmem:[#allocation4 + $0x20] sm:$0xf] %v655_v11  ;;  %v667_v27 = vpop.permute.xlu1 %666  ;;  %v1187_v24 = vpop.permute.xlu0 %1186  ;;  %884 = vmatpush1.bf16.msra.mxu0 %v2180_v6  ;;  %v654_v16 = vsel %vm133_vm8, %v648_v46, %v653_v29  ;;  %v2371_v29 = vld [vmem:[#allocation2 + $0x24] ss:$16 sps:$4 sm:$0xff]  }
 0x213   :  { %v669_v12 = vrot.slane %v667_v27, 4  ;;  %v1192_v10 = vrot.slane %v1187_v24, 4 }
 0x215   :  { %v670_v13 = vsel %vm87_vm0, %v668_v26, %v669_v12  ;;  %v672_v14 = vsel %vm178_vm9, %v667_v27, %v669_v12  ;;  %v2362_v15 = vld [vmem:[#allocation4 + $0x38] ss:$12 sps:$4 sm:$0xff]   ;;  %v2229_v27 = vcombine.high %v1474_v2, %v1474_v2  ;;  %v2228_v26 = vcombine.low %v1474_v2, %v1474_v2  ;;  %v2369_v12 = vld [vmem:[#allocation2 + $0x20] ss:$16 sps:$4 sm:$0xff]  }
 0x216   :  { %v671_v17 = vsel %vm178_vm9, %v665_v54, %v670_v13  ;;  %676 = vst [vmem:[#allocation4 + $0x2c] sm:$0xf] %v672_v14  ;;  %v633_v18 = vpop.permute.xlu1 %632  ;;  %v1191_v9 = vpop.permute.xlu0 %1190  ;;  %2286 = vmatpush3.bf16.msra.mxu1 %v2362_v15  ;;  %v2374_v14 = vld [vmem:[#allocation2 + $0x2c] ss:$16 sps:$4 sm:$0xff]  }
 0x217   :  { %v635_v19 = vrot.slane %v633_v18, 4  ;;  %v2178_v20 = vcombine.high %v654_v16, %v671_v17  ;;  %v2177_v28 = vcombine.low %v654_v16, %v671_v17  ;;  %2287 = vmatprep.subr.bf16.mxu1 %v2397_v31  ;;  %v1194_v22 = vrot.slane %v1191_v9, 4  ;;  %v2372_v16 = vld [vmem:[#allocation2 + $0x28] ss:$16 sps:$4 sm:$0xff]   ;;  %v1464_v9 = vld [vmem:[%s2959_s2] sm:$0xf] }
 0x218   :  { %v1541_v13 = vsel %vm479_vm4, %v2228_v26, 0 }
 0x219   :  { %v636_v30 = vsel %vm87_vm0, %v634_v25, %v635_v19  ;;  %v638_v21 = vsel %vm89_vm7, %v633_v18, %v635_v19  ;;  %885 = vmatprep.subr.bf16.mxu0 %v2178_v20 }
 0x21a   :  { %v637_v32 = vsel %vm89_vm7, %v631_v0, %v636_v30  ;;  %642 = vst [vmem:[#allocation4 + $0x14] sm:$0xf] %v638_v21  ;;  %v1189_v33 = vpop.permute.xlu1 %1188  ;;  %v1233_v34 = vpop.permute.xlu0 %1232  ;;  %886 = vmatpush1.bf16.msra.mxu0 %v2177_v28  ;;  %v2227_v0 = vcombine.high %v1473_v58, %v1473_v58 }
 0x21b   :  { %v1193_v35 = vrot.slane %v1189_v33, 4  ;;  %v2175_v36 = vcombine.high %v2685_v4, %v637_v32  ;;  %v2174_v37 = vcombine.low %v2685_v4, %v637_v32  ;;  %v1237_v43 = vrot.slane %v1233_v34, 4 }
 0x21d   :  { %v1195_v39 = vsel %vm87_vm0, %v1192_v10, %v1193_v35  ;;  %v1197_v42 = vsel %vm87_vm0, %v1193_v35, %v1194_v22  ;;  %v2363_v45 = vld [vmem:[#allocation4 + $0x20] ss:$12 sps:$4 sm:$0xff]   ;;  %887 = vmatprep.subr.bf16.mxu0 %v2175_v36 }
 0x21e   :  { %v1196_v46 = vsel %vm133_vm8, %v1187_v24, %v1195_v39  ;;  %v1198_v47 = vsel %vm133_vm8, %v1189_v33, %v1197_v42  ;;  %v1231_v48 = vpop.permute.xlu1 %1230  ;;  %v981_v49 = vpop.permute.xlu0 %980  ;;  %888 = vmatpush1.bf16.msra.mxu0 %v2174_v37  ;;  %2288 = vmatpush3.bf16.msra.mxu1 %v2363_v45  ;;  %v1535_v24 = vsel %vm479_vm4, %v2226_v1, 0 }
 0x21f   :  { %1201 = vst [vmem:[#allocation2 + $0x10] sm:$0x33] %v1196_v46  ;;  %1202 = vst [vmem:[#allocation2 + $0x18] sm:$0x33] %v1198_v47  ;;  %v1236_v4 = vrot.slane %v1231_v48, 4  ;;  %2289 = vmatprep.subr.bf16.mxu1 %v2397_v31 }
 0x220   :  { %v1632_v47 = vld [vmem:[%s2960_s1] sm:$0xf] }
 0x221   :  { %v1239_v51 = vsel %vm87_vm0, %v1236_v4, %v1237_v43  ;;  %v2364_v52 = vld [vmem:[#allocation4 + $0x8] ss:$12 sps:$4 sm:$0xff]   ;;  %2190 = vmatmul.mubr.msk.bf16.vlgmr.msra.gmra.mxu0 %vm859_vm12, %v762_v50  ;;  %v1637_v4 = vrot.slane %v1632_v47, %v582_v40 }
 0x222   :  { %v1240_v53 = vsel %vm178_vm9, %v1231_v48, %v1239_v51  ;;  %v1235_v54 = vpop.permute.xlu1 %1234  ;;  %1036 = vmatprep.mubr.bf16.mxu0 %v2396_v23  ;;  %2290 = vmatpush3.bf16.msra.mxu1 %v2364_v52  ;;  %v985_v56 = vpop.permute.xlu0 %984  ;;  %v1641_v52 = vrot.slane %v1632_v47, %v586_v41 }
 0x223   :  { %1245 = vst [vmem:[#allocation2 + $0x10] sm:$0xcc] %v1240_v53  ;;  %v1238_v55 = vrot.slane %v1235_v54, 4  ;;  %2295 = vmatprep.subr.bf16.mxu1 %v2397_v31 }
 0x225   :  { %v1241_v57 = vsel %vm87_vm0, %v1237_v43, %v1238_v55  ;;  %2292 = vmatmul.mubr.msk.bf16.vlgmr.msra.gmra.mxu1 %vm859_vm12, %v762_v50 }
 0x226   :  { %v1242_v59 = vsel %vm178_vm9, %v1233_v34, %v1241_v57  ;;  %v983_v60 = vpop.permute.xlu1 %982  ;;  %2297 = vmatprep.mubr.msk.bf16.mxu1 %vm2398_vm11, %v2397_v31  ;;  %v1645_v57 = vrot.slane %v1632_v47, %v590_v38 }
 0x227   :  { %1246 = vst [vmem:[#allocation2 + $0x18] sm:$0xcc] %v1242_v59  ;;  %v988_v61 = vsel %vm400_vm1, %v981_v49, %v983_v60  ;;  %v989_v62 = vsel %vm400_vm1, %v983_v60, %v985_v56  ;;  %v1649_v59 = vrot.slane %v1632_v47, %v594_v44  ;;  %v2254_v44 = vld [vmem:[%s2957_s0 + $0xa] sm:$0xff] }
 0x228   :  { %v996_v63 = vsel %vm479_vm4, %v988_v61, 0  ;;  %2192 = vmatprep.subr.msk.bf16.mxu0 %vm479_vm4, %v989_v62 }
 0x229   :  { %1019 = vmatpush1.bf16.msra.mxu0 %v996_v63 }
 0x22a   :  { %v987_v6 = vpop.permute.xlu1 %986  ;;  %2230 = vmatprep.subr.msk.bf16.mxu0 %vm479_vm4, %v2227_v0  ;;  %v2377_v15 = vld [vmem:[#allocation2 + $0x4] ss:$16 sps:$4 sm:$0xff]   ;;  %v2375_v17 = vld [vmem:[#allocation2] ss:$16 sps:$4 sm:$0xff]  }
 0x22b   :  { %v990_v7 = vsel %vm400_vm1, %v985_v56, %v987_v6 }
 0x22c   :  { %v1002_v11 = vsel %vm479_vm4, %v990_v7, 0  ;;  %2193 = vmatmul.mubr.msk.bf16.vlgmr.msra.gmra.mxu0 %vm991_vm13, %v955_v3  ;;  %v2022_v7 = vrot.slane %v2254_v44, %v2454_v8 }
 0x22d   :  { %2296 = vmatpush3.bf16.msra.mxu1 %v1002_v11  ;;  %1557 = vmatpush1.bf16.msra.mxu0 %v1535_v24  ;;  %v2015_v11 = vcombine.high %v2254_v44, %v2254_v44 }
 0x22e   :  { %2232 = vmatprep.subr.msk.bf16.mxu1 %vm479_vm4, %v2229_v27  ;;  %1558 = vmatprep.subr.bf16.mxu0 %v2371_v29  ;;  %v2380_v18 = vld [vmem:[#allocation2 + $0xc] ss:$16 sps:$4 sm:$0xff]   ;;  %v2378_v25 = vld [vmem:[#allocation2 + $0x8] ss:$16 sps:$4 sm:$0xff]   ;;  %v2030_v27 = vcombine.high %v2022_v7, %v2022_v7  ;;  %v781_v29 = vld [vmem:[%s2963_s5] sm:$0xff] }
 0x22f   :  { %1578 = vmatprep.mubr.bf16.mxu0 %v2396_v23  ;;  %v1479_v45 = vpop.permute.xlu0 %1478  ;;  %v2029_v24 = vrot.slane %v2015_v11, %v2454_v8 }
 0x230   :  { %2298 = vmatmul.mubr.msk.bf16.vlgmr.msra.gmra.mxu1 %vm991_vm13, %v955_v3 }
 0x231   :  { %1598 = vmatpush1.bf16.msra.mxu1 %v1541_v13  ;;  %1559 = vmatpush1.bf16.msra.mxu0 %v2369_v12  ;;  %v2031_v26 = vcombine.high %v2029_v24, %v2029_v24  ;;  %v956_v12 = vld [vmem:[%s2964_s7] sm:$0xff] }
 0x232   :  { %1599 = vmatprep.subr.bf16.mxu1 %v2374_v14  ;;  %1560 = vmatprep.subr.bf16.mxu0 %v2377_v15 }
 0x233   :  { %1619 = vmatprep.mubr.bf16.mxu1 %v2396_v23 }
 0x235   :  { %1600 = vmatpush1.bf16.msra.mxu1 %v2372_v16  ;;  %1561 = vmatpush1.bf16.msra.mxu0 %v2375_v17 }
 0x236   :  { %1601 = vmatprep.subr.bf16.mxu1 %v2380_v18 }
 0x238   :  { %2231 = vmatmul.mubr.msk.bf16.vlgmr.msra.gmra.mxu0 %vm475_vm10, %v1464_v9 }
 0x239   :  { %1602 = vmatpush1.bf16.msra.mxu1 %v2378_v25  ;;  %1957 = vmatprep.mubr.bf16.mxu0 %v2396_v23 }
 0x23a   :  { %2301 = vmatprep.subr.bf16.mxu1 %v2397_v31 }
 0x23c   :  { %2233 = vmatmul.mubr.msk.bf16.vlgmr.msra.gmra.mxu1 %vm475_vm10, %v1464_v9 }
 0x23d   :  { %2311 = vmatprep.mubr.msk.bf16.mxu1 %vm2398_vm11, %v2397_v31 }
 0x2e1   :  { %v2816_v19 = vpop.f32.mrf.mxu0 }
 0x2e3   :  { %v2818_v20 = vpop.f32.mrf.mxu0 }
 0x2e5   :  { %v911_v28 = vpop.f32.mrf.mxu0  ;;  %v2820_v10 = vpop.f32.mrf.mxu1 }
 0x2e7   :  { %v912_v30 = vpop.f32.mrf.mxu0  ;;  %v2293_v21 = vpop.f32.mrf.mxu1 }
 0x2e9   :  { %v951_v22 = vpop.f32.mrf.mxu1 }
 0x2eb   :  { %v2294_v32 = vpop.f32.mrf.mxu1 }
 0x2ec   :  { %v2822_v33 = vpop.f32.mrf.mxu0 }
 0x2ee   :  { %v2824_v34 = vpop.f32.mrf.mxu0 }
 0x2f0   :  { %v2826_v35 = vpop.f32.mrf.mxu1  ;;  %v1042_v36 = vpop.f32.mrf.mxu0 }
 0x2f2   :  { %v2299_v37 = vpop.f32.mrf.mxu1  ;;  %v1043_v39 = vpop.f32.mrf.mxu0 }
 0x2f4   :  { %v1082_v42 = vpop.f32.mrf.mxu1 }
 0x2f6   :  { %v2300_v43 = vpop.f32.mrf.mxu1 }
 0x2f8   :  { %v1580_v46 = vpop.f32.mrf.mxu0 }
 0x2f9   :  { %v1581_v48 = vadd.f32 %v1580_v46, %v1479_v45 }
 0x2fa   :  { %v1582_v49 = vpop.f32.mrf.mxu0 }
 0x2fb   :  { %v1628_v50 = vmax.f32 %v1581_v48, 0.0  ;;  %v1583_v51 = vadd.f32 %v1582_v49, %v1479_v45 }
 0x2fc   :  { %v1621_v53 = vpop.f32.mrf.mxu1  ;;  %v1584_v54 = vpop.f32.mrf.mxu0 }
 0x2fd   :  { %v1622_v55 = vadd.f32 %v1621_v53, %v1479_v45  ;;  %v1629_v56 = vmax.f32 %v1583_v51, 0.0  ;;  %v1654_v61 = vmul.f32 %v1637_v4, %v1628_v50 }
 0x2fe   :  { %v1623_v58 = vpop.f32.mrf.mxu1  ;;  %v1585_v60 = vpop.f32.mrf.mxu0 }
 0x2ff   :  { %v1630_v62 = vmax.f32 %v1622_v55, 0.0  ;;  %v1655_v63 = vmul.f32 %v1641_v52, %v1629_v56  ;;  %v1624_v40 = vadd.f32 %v1623_v58, %v1479_v45 }
 0x300   :  { %v1625_v0 = vpop.f32.mrf.mxu1 }
 0x301   :  { %v2839_v1 = vpack.c.bf16 %v1655_v63, %v1654_v61  ;;  %v1631_v41 = vmax.f32 %v1624_v40, 0.0  ;;  %v1656_v3 = vmul.f32 %v1645_v57, %v1630_v62 }
 0x302   :  { %v1626_v2 = vpop.f32.mrf.mxu1 }
 0x303   :  { %v1657_v6 = vmul.f32 %v1649_v59, %v1631_v41  ;;  %1803 = vrot.lane.b32.xlu1 %v2839_v1, %s2388_s9 }
 0x305   :  { %v2264_v38 = vpack.c.bf16 %v1657_v6, %v1656_v3 }
 0x307   :  { %1675 = vst [vmem:[#allocation3 + $0x8] sm:$0xff] %v2264_v38  ;;  %1805 = vrot.lane.b32.xlu0 %v2264_v38, %s2388_s9  ;;  %1769 = vrot.lane.b32.xlu1 %v2839_v1, %s2391_s14 }
 0x30b   :  { %1771 = vrot.lane.b32.xlu0 %v2264_v38, %s2391_s14  ;;  %1786 = vrot.lane.b32.xlu1 %v2839_v1, %s2392_s15 }
 0x30e   :  { %v1677_v5 = vld [vmem:[#allocation3 + $0x8] sm:$0xf] }
 0x30f   :  { %1788 = vrot.lane.b32.xlu0 %v2264_v38, %s2392_s15  ;;  %1735 = vrot.lane.b32.xlu1 %v2839_v1, %s2389_s10  ;;  %1679 = vst [vmem:[#allocation4 + $0x8] sm:$0xf] %v1677_v5 }
 0x313   :  { %1737 = vrot.lane.b32.xlu0 %v2264_v38, %s2389_s10  ;;  %1752 = vrot.lane.b32.xlu1 %v2839_v1, %s2390_s11 }
 0x317   :  { %1754 = vrot.lane.b32.xlu0 %v2264_v38, %s2390_s11  ;;  %1701 = vrot.lane.b32.xlu1 %v2839_v1, %s2394_s21 }
 0x31b   :  { %1703 = vrot.lane.b32.xlu0 %v2264_v38, %s2394_s21  ;;  %1718 = vrot.lane.b32.xlu1 %v2839_v1, %s2395_s24 }
 0x31f   :  { %1720 = vrot.lane.b32.xlu0 %v2264_v38, %s2395_s24  ;;  %1684 = vrot.lane.b32.xlu1 %v2839_v1, %s2393_s20 }
 0x323   :  { %1686 = vrot.lane.b32.xlu0 %v2264_v38, %s2393_s20  ;;  %2032 = vrot.lane.b32.xlu1 %v2022_v7, %s2388_s9 }
 0x327   :  { %2034 = vrot.lane.b32.xlu0 %v2030_v27, %s2388_s9  ;;  %2036 = vrot.lane.b32.xlu1 %v2029_v24, %s2388_s9 }
 0x32b   :  { %2038 = vrot.lane.b32.xlu0 %v2031_v26, %s2388_s9  ;;  %784 = vperm.xlu1 %2334, %v781_v29  }
 0x32f   :  { %959 = vperm.xlu0 %2333, %v956_v12   ;;  %1838 = vperm.xlu1 %2334, %v781_v29  }
 0x333   :  { %2011 = vperm.xlu0 %2333, %v956_v12  }
 0x375   :  { %v1804_v8 = vpop.permute.xlu1 %1803 }
 0x376   :  { %v1807_v15 = vrot.slane %v1804_v8, 4 }
 0x379   :  { %v1806_v13 = vpop.permute.xlu0 %1805  ;;  %v1770_v14 = vpop.permute.xlu1 %1769 }
 0x37a   :  { %v1808_v16 = vrot.slane %v1806_v13, 4  ;;  %v1773_v30 = vrot.slane %v1770_v14, 4 }
 0x37c   :  { %v1809_v17 = vsel %vm87_vm0, %v1807_v15, %v1808_v16  ;;  %v1811_v18 = vsel %vm400_vm1, %v1806_v13, %v1808_v16 }
 0x37d   :  { %v1810_v9 = vsel %vm400_vm1, %v1804_v8, %v1809_v17  ;;  %1815 = vst [vmem:[#allocation4 + $0x68] sm:$0xf] %v1811_v18  ;;  %v1772_v25 = vpop.permute.xlu0 %1771  ;;  %v1787_v28 = vpop.permute.xlu1 %1786 }
 0x37e   :  { %v1774_v21 = vrot.slane %v1772_v25, 4  ;;  %v2249_v22 = vcombine.high %v1810_v9, %v1810_v9  ;;  %v2248_v32 = vcombine.low %v1810_v9, %v1810_v9  ;;  %v1790_v46 = vrot.slane %v1787_v28, 4 }
 0x380   :  { %v1775_v36 = vsel %vm87_vm0, %v1773_v30, %v1774_v21  ;;  %v1777_v37 = vsel %vm311_vm5, %v1772_v25, %v1774_v21  ;;  %2251 = vmatprep.subr.msk.bf16.mxu0 %vm87_vm0, %v2249_v22  ;;  %v1917_v39 = vsel %vm87_vm0, %v2248_v32, 0 }
 0x381   :  { %v1776_v42 = vsel %vm311_vm5, %v1770_v14, %v1775_v36  ;;  %1781 = vst [vmem:[#allocation4 + $0x50] sm:$0xf] %v1777_v37  ;;  %v1789_v43 = vpop.permute.xlu0 %1788  ;;  %v1736_v45 = vpop.permute.xlu1 %1735  ;;  %1932 = vmatpush1.bf16.msra.mxu0 %v1917_v39 }
 0x382   :  { %v1791_v47 = vrot.slane %v1789_v43, 4  ;;  %v1739_v53 = vrot.slane %v1736_v45, 4 }
 0x384   :  { %v1792_v48 = vsel %vm87_vm0, %v1790_v46, %v1791_v47  ;;  %v1794_v49 = vsel %vm356_vm6, %v1789_v43, %v1791_v47  ;;  %v2382_v50 = vld [vmem:[#allocation4 + $0x68] ss:$0 sps:$4 sm:$0xff]  }
 0x385   :  { %v1793_v4 = vsel %vm356_vm6, %v1787_v28, %v1792_v48  ;;  %1798 = vst [vmem:[#allocation4 + $0x5c] sm:$0xf] %v1794_v49  ;;  %v1738_v51 = vpop.permute.xlu0 %1737  ;;  %v1753_v52 = vpop.permute.xlu1 %1752  ;;  %v1923_v55 = vsel %vm87_vm0, %v2382_v50, 0  ;;  %v1816_v49 = vld [vmem:[%s2961_s4] sm:$0xf] }
 0x386   :  { %v1740_v54 = vrot.slane %v1738_v51, 4  ;;  %v2245_v56 = vcombine.low %v1776_v42, %v1793_v4  ;;  %2302 = vmatpush3.bf16.msra.mxu1 %v1923_v55  ;;  %v2246_v57 = vcombine.high %v1776_v42, %v1793_v4  ;;  %v1756_v63 = vrot.slane %v1753_v52, 4 }
 0x387   :  { %2303 = vmatprep.subr.bf16.mxu1 %v2397_v31 }
 0x388   :  { %v1741_v58 = vsel %vm87_vm0, %v1739_v53, %v1740_v54  ;;  %v1743_v59 = vsel %vm222_vm2, %v1738_v51, %v1740_v54  ;;  %1933 = vmatprep.subr.bf16.mxu0 %v2246_v57 }
 0x389   :  { %v1742_v60 = vsel %vm222_vm2, %v1736_v45, %v1741_v58  ;;  %1747 = vst [vmem:[#allocation4 + $0x38] sm:$0xf] %v1743_v59  ;;  %v1755_v61 = vpop.permute.xlu0 %1754  ;;  %v1702_v62 = vpop.permute.xlu1 %1701  ;;  %1934 = vmatpush1.bf16.msra.mxu0 %v2245_v56 }
 0x38a   :  { %v1757_v40 = vrot.slane %v1755_v61, 4  ;;  %v1705_v5 = vrot.slane %v1702_v62, 4 }
 0x38c   :  { %v1758_v0 = vsel %vm87_vm0, %v1756_v63, %v1757_v40  ;;  %v1760_v41 = vsel %vm267_vm3, %v1755_v61, %v1757_v40  ;;  %v2383_v2 = vld [vmem:[#allocation4 + $0x50] ss:$12 sps:$4 sm:$0xff]  }
 0x38d   :  { %v1759_v3 = vsel %vm267_vm3, %v1753_v52, %v1758_v0  ;;  %1764 = vst [vmem:[#allocation4 + $0x44] sm:$0xf] %v1760_v41  ;;  %v1704_v6 = vpop.permute.xlu0 %1703  ;;  %v1719_v38 = vpop.permute.xlu1 %1718  ;;  %2304 = vmatpush3.bf16.msra.mxu1 %v2383_v2  ;;  %v2007_v52 = vld [vmem:[%s2962_s6] sm:$0xf] }
 0x38e   :  { %v1706_v44 = vrot.slane %v1704_v6, 4  ;;  %v2242_v7 = vcombine.low %v1742_v60, %v1759_v3  ;;  %v2243_v11 = vcombine.high %v1742_v60, %v1759_v3  ;;  %2305 = vmatprep.subr.bf16.mxu1 %v2397_v31  ;;  %v1722_v8 = vrot.slane %v1719_v38, 4 }
 0x390   :  { %v1707_v27 = vsel %vm87_vm0, %v1705_v5, %v1706_v44  ;;  %v1709_v24 = vsel %vm133_vm8, %v1704_v6, %v1706_v44  ;;  %1935 = vmatprep.subr.bf16.mxu0 %v2243_v11 }
 0x391   :  { %v1708_v26 = vsel %vm133_vm8, %v1702_v62, %v1707_v27  ;;  %1713 = vst [vmem:[#allocation4 + $0x20] sm:$0xf] %v1709_v24  ;;  %v1721_v29 = vpop.permute.xlu0 %1720  ;;  %v1685_v12 = vpop.permute.xlu1 %1684  ;;  %1936 = vmatpush1.bf16.msra.mxu0 %v2242_v7 }
 0x392   :  { %v1723_v13 = vrot.slane %v1721_v29, 4  ;;  %v1688_v25 = vrot.slane %v1685_v12, 4 }
 0x394   :  { %v1724_v14 = vsel %vm87_vm0, %v1722_v8, %v1723_v13  ;;  %v1726_v15 = vsel %vm178_vm9, %v1721_v29, %v1723_v13  ;;  %v2384_v16 = vld [vmem:[#allocation4 + $0x38] ss:$12 sps:$4 sm:$0xff]  }
 0x395   :  { %v1725_v17 = vsel %vm178_vm9, %v1719_v38, %v1724_v14  ;;  %1730 = vst [vmem:[#allocation4 + $0x2c] sm:$0xf] %v1726_v15  ;;  %v1687_v18 = vpop.permute.xlu0 %1686  ;;  %v2033_v9 = vpop.permute.xlu1 %2032  ;;  %2306 = vmatpush3.bf16.msra.mxu1 %v2384_v16 }
 0x396   :  { %v1689_v28 = vrot.slane %v1687_v18, 4  ;;  %v2239_v30 = vcombine.low %v1708_v26, %v1725_v17  ;;  %v2240_v21 = vcombine.high %v1708_v26, %v1725_v17  ;;  %2307 = vmatprep.subr.bf16.mxu1 %v2397_v31 }
 0x398   :  { %v1690_v22 = vsel %vm87_vm0, %v1688_v25, %v1689_v28  ;;  %v1692_v32 = vsel %vm89_vm7, %v1687_v18, %v1689_v28  ;;  %1937 = vmatprep.subr.bf16.mxu0 %v2240_v21 }
 0x399   :  { %v1691_v36 = vsel %vm89_vm7, %v1685_v12, %v1690_v22  ;;  %1696 = vst [vmem:[#allocation4 + $0x14] sm:$0xf] %v1692_v32  ;;  %1938 = vmatpush1.bf16.msra.mxu0 %v2239_v30  ;;  %v2035_v37 = vpop.permute.xlu0 %2034  ;;  %v2037_v39 = vpop.permute.xlu1 %2036 }
 0x39a   :  { %v2236_v42 = vcombine.low %v2839_v1, %v1691_v36  ;;  %v2237_v43 = vcombine.high %v2839_v1, %v1691_v36  ;;  %v2040_v45 = vsel %vm400_vm1, %v2033_v9, %v2035_v37  ;;  %v2041_v46 = vsel %vm400_vm1, %v2035_v37, %v2037_v39 }
 0x39b   :  { %v2047_v50 = vsel %vm479_vm4, %v2040_v45, 0 }
 0x39c   :  { %v2385_v47 = vld [vmem:[#allocation4 + $0x20] ss:$12 sps:$4 sm:$0xff]   ;;  %1939 = vmatprep.subr.bf16.mxu0 %v2237_v43 }
 0x39d   :  { %1940 = vmatpush1.bf16.msra.mxu0 %v2236_v42  ;;  %v2039_v48 = vpop.permute.xlu0 %2038  ;;  %2308 = vmatpush3.bf16.msra.mxu1 %v2385_v47 }
 0x39e   :  { %2255 = vmatprep.subr.msk.bf16.mxu0 %vm479_vm4, %v2041_v46  ;;  %2309 = vmatprep.subr.bf16.mxu1 %v2397_v31  ;;  %v2042_v4 = vsel %vm400_vm1, %v2037_v39, %v2039_v48 }
 0x39f   :  { %v2053_v51 = vsel %vm479_vm4, %v2042_v4, 0 }
 0x3a0   :  { %v2386_v1 = vld [vmem:[#allocation4 + $0x8] ss:$12 sps:$4 sm:$0xff]   ;;  %2252 = vmatmul.mubr.msk.bf16.vlgmr.msra.gmra.mxu0 %vm859_vm12, %v1816_v49 }
 0x3a1   :  { %2070 = vmatpush1.bf16.msra.mxu0 %v2047_v50  ;;  %2087 = vmatprep.mubr.bf16.mxu0 %v2396_v23 }
 0x3a2   :  { %2310 = vmatpush3.bf16.msra.mxu1 %v2386_v1 }
 0x3a3   :  { %2315 = vmatprep.subr.bf16.mxu1 %v2397_v31 }
 0x3a5   :  { %2312 = vmatmul.mubr.msk.bf16.vlgmr.msra.gmra.mxu1 %vm859_vm12, %v1816_v49 }
 0x3a6   :  { %2316 = vmatpush3.bf16.msra.mxu1 %v2053_v51  ;;  %2317 = vmatprep.mubr.msk.bf16.mxu1 %vm2398_vm11, %v2397_v31  ;;  %v785_v53 = vpop.permute.xlu1 %784 }
 0x3a7   :  { %v908_v23 = vadd.f32 %v2816_v19, %v785_v53  ;;  %v910_v54 = vadd.f32 %v2818_v20, %v785_v53  ;;  %v949_v56 = vadd.f32 %v2820_v10, %v785_v53 }
 0x3a8   :  { %2256 = vmatmul.mubr.msk.bf16.vlgmr.msra.gmra.mxu0 %vm991_vm13, %v2007_v52 }
 0x3aa   :  { %v960_v55 = vpop.permute.xlu0 %959 }
 0x3ab   :  { %v1039_v57 = vadd.f32 %v2822_v33, %v960_v55  ;;  %v1041_v58 = vadd.f32 %v2824_v34, %v960_v55  ;;  %v1080_v59 = vadd.f32 %v2826_v35, %v960_v55  ;;  %v1839_v34 = vpop.permute.xlu1 %1838 }
 0x3ad   :  { %v1085_v60 = vadd.f32 %v1039_v57, %v908_v23  ;;  %v1086_v61 = vadd.f32 %v1041_v58, %v910_v54  ;;  %v1087_v62 = vadd.f32 %v1080_v59, %v949_v56  ;;  %2318 = vmatmul.mubr.msk.bf16.vlgmr.msra.gmra.mxu1 %vm991_vm13, %v2007_v52 }
 0x3ae   :  { %v2012_v41 = vpop.permute.xlu0 %2011 }
 0x3af   :  { %v1088_v31 = vmax.f32 %v1085_v60, 0.0  ;;  %v1089_v63 = vmax.f32 %v1086_v61, 0.0  ;;  %v1090_v40 = vmax.f32 %v1087_v62, 0.0 }
 0x3b1   :  { %1091 = vst [vmem:[%s2965_s8] sm:$0xff] %v1088_v31  ;;  %1092 = vst [vmem:[%s2965_s8 + $0x8] sm:$0xff] %v1089_v63 }
 0x3b2   :  { %1093 = vst [vmem:[%s2965_s8 + $0x10] sm:$0xff] %v1090_v40 }
 0x460   :  { %v1959_v19 = vpop.f32.mrf.mxu0 }
 0x461   :  { %v1960_v6 = vadd.f32 %v1959_v19, %v1839_v34 }
 0x462   :  { %v1961_v20 = vpop.f32.mrf.mxu0 }
 0x463   :  { %v1962_v44 = vadd.f32 %v1961_v20, %v1839_v34 }
 0x464   :  { %v1963_v10 = vpop.f32.mrf.mxu0 }
 0x465   :  { %v2000_v33 = vpop.f32.mrf.mxu1 }
 0x466   :  { %v1964_v35 = vpop.f32.mrf.mxu0  ;;  %v2001_v8 = vadd.f32 %v2000_v33, %v1839_v34 }
 0x467   :  { %v2313_v0 = vpop.f32.mrf.mxu1 }
 0x468   :  { %v2089_v2 = vpop.f32.mrf.mxu0 }
 0x469   :  { %v2003_v3 = vpop.f32.mrf.mxu1  ;;  %v2090_v38 = vadd.f32 %v2089_v2, %v2012_v41 }
 0x46a   :  { %v2091_v5 = vpop.f32.mrf.mxu0 }
 0x46b   :  { %v2314_v7 = vpop.f32.mrf.mxu1  ;;  %v2136_v11 = vadd.f32 %v2090_v38, %v1960_v6  ;;  %v2092_v27 = vadd.f32 %v2091_v5, %v2012_v41 }
 0x46c   :  { %v2093_v24 = vpop.f32.mrf.mxu0 }
 0x46d   :  { %v2130_v26 = vpop.f32.mrf.mxu1  ;;  %v2139_v29 = vmax.f32 %v2136_v11, 0.0  ;;  %v2137_v12 = vadd.f32 %v2092_v27, %v1962_v44 }
 0x46e   :  { %v2131_v13 = vadd.f32 %v2130_v26, %v2012_v41  ;;  %v2094_v14 = vpop.f32.mrf.mxu0 }
 0x46f   :  { %2258 = vst [vmem:[%s2965_s8 + $0x18] sm:$0xff] %v2139_v29  ;;  %v2140_v15 = vmax.f32 %v2137_v12, 0.0  ;;  %v2319_v16 = vpop.f32.mrf.mxu1 }
 0x470   :  { %v2138_v17 = vadd.f32 %v2131_v13, %v2001_v8 }
 0x471   :  { %2259 = vst [vmem:[%s2965_s8 + $0x20] sm:$0xff] %v2140_v15  ;;  %v2133_v18 = vpop.f32.mrf.mxu1 }
 0x472   :  { %v2141_v9 = vmax.f32 %v2138_v17, 0.0 }
 0x473   :  { %v2320_v25 = vpop.f32.mrf.mxu1 }
 0x474   :  { %2260 = vst [vmem:[%s2965_s8 + $0x28] sm:$0xff] %v2141_v9 }

</bundles_post_ra>
